<compile_context>
chip_gen: v6e
topology: v6e:2x2x1
jax: 0.10.0
libtpu: 0.0.40
codegen_flags: <defaults>
</compile_context>

<pallas_src>
import functools
import math

import jax
import jax.numpy as jnp
from jax import lax
from jax.experimental import pallas as pl
from jax.experimental.pallas import tpu as pltpu


def _layer_norm(x, gamma, beta, eps):
    # x: (T, H) f32; gamma/beta: (1, H). Biased variance (PyTorch LayerNorm).
    mean = jnp.mean(x, axis=-1, keepdims=True)
    var = jnp.mean(jnp.square(x - mean), axis=-1, keepdims=True)
    return (x - mean) * lax.rsqrt(var + eps) * gamma + beta


def _gelu_erf(x):
    # Exact erf GELU (matches F.gelu default). f32 VPU polynomial.
    return 0.5 * x * (1.0 + lax.erf(x * (1.0 / math.sqrt(2.0))))


_SQRT_2_OVER_PI = math.sqrt(2.0 / math.pi)


def _gelu_tanh(x):
    # tanh-approx GELU: transcendental goes to the EUP slot (frees the VALU
    # during the FFN phase on v6e/v7x). Max |diff| vs exact erf GELU ~3e-3.
    return 0.5 * x * (1.0 + jnp.tanh(_SQRT_2_OVER_PI * (x + 0.044715 * (x * x * x))))


def bert_layer_kernel(
    x_ref, mask_ref,
    wq_ref, bq_ref, wk_ref, bk_ref, wv_ref, bv_ref,
    wad_ref, bad_ref, g1_ref, be1_ref,
    wi_ref, bi_ref, wo_ref, bo_ref, g2_ref, be2_ref,
    o_ref,
    kv_ref, q_ref, ctx_ref,
    *, num_heads, head_dim, eps, tq, gelu_approx,
):
    b = pl.program_id(0)
    qi = pl.program_id(1)
    S = x_ref.shape[1]
    scale = 1.0 / math.sqrt(head_dim)

    # ---- once per batch element: K / V projection for the full sequence ----
    # Separate column-sliced dots so the largest f32 temporary is (S, H).
    @pl.when(qi == 0)
    def _():
        xf = x_ref[0].astype(jnp.bfloat16)                                   # (S, H)
        k = jnp.dot(xf, wk_ref[...], preferred_element_type=jnp.float32) + bk_ref[...]
        kv_ref[0] = k.astype(jnp.bfloat16)
        v = jnp.dot(xf, wv_ref[...], preferred_element_type=jnp.float32) + bv_ref[...]
        kv_ref[1] = v.astype(jnp.bfloat16)

    # ---- steady state: Q projection for this query tile only ----
    row0 = pl.multiple_of(qi * tq, tq)
    x_t = x_ref[0, pl.ds(row0, tq), :]                                       # (tq, H) f32 residual
    q = jnp.dot(x_t.astype(jnp.bfloat16), wq_ref[...],
                preferred_element_type=jnp.float32) + bq_ref[...]
    q_ref[...] = (q * scale).astype(jnp.bfloat16)                            # pre-scaled Q

    # (1, S) additive mask row; added straight to the (tq, S) scores
    # (free sublane broadcast -> no (tq, S) broadcast temporary).
    mask_row = mask_ref[pl.ds(b, 1), :].astype(jnp.float32)

    contract_last = (((1,), (1,)), ((), ()))   # q @ k^T without materializing k^T

    def one_head(q_h, k_h, v_h):
        s = lax.dot_general(q_h, k_h, contract_last,
                            preferred_element_type=jnp.float32)              # (tq, S) f32
        s = s + mask_row
        s = s - jnp.max(s, axis=-1, keepdims=True)
        p = jnp.exp(s)
        # EUP approximate reciprocal in the softmax normalization (~1e-3 rel
        # deviation from an exact divide; covered by the test tolerance).
        p = p * pl.reciprocal(jnp.sum(p, axis=-1, keepdims=True), approx=True)
        return jnp.dot(p.astype(jnp.bfloat16), v_h,
                       preferred_element_type=jnp.float32)                   # (tq, hd) f32

    # Heads in pairs -> each context store is 2*head_dim lanes wide (128 for
    # BERT-base/large): lane-dense, unmasked stores. Static slices keep the
    # lowering trivial (no dynamic lane offsets).
    pair_w = 2 * head_dim
    for hp in range(num_heads // 2):
        lo = hp * pair_w
        c0 = one_head(q_ref[:, lo:lo + head_dim],
                      kv_ref[0, :, lo:lo + head_dim],
                      kv_ref[1, :, lo:lo + head_dim])
        c1 = one_head(q_ref[:, lo + head_dim:lo + pair_w],
                      kv_ref[0, :, lo + head_dim:lo + pair_w],
                      kv_ref[1, :, lo + head_dim:lo + pair_w])
        ctx_ref[:, lo:lo + pair_w] = jnp.concatenate([c0, c1], axis=-1).astype(jnp.bfloat16)
    if num_heads % 2:
        lo = (num_heads - 1) * head_dim
        c = one_head(q_ref[:, lo:lo + head_dim],
                     kv_ref[0, :, lo:lo + head_dim],
                     kv_ref[1, :, lo:lo + head_dim])
        ctx_ref[:, lo:lo + head_dim] = c.astype(jnp.bfloat16)

    # ---- add & norm #1 (attention output dense + residual + layernorm) ----
    attn = jnp.dot(ctx_ref[...], wad_ref[...],
                   preferred_element_type=jnp.float32) + bad_ref[...]
    h1 = _layer_norm(x_t + attn, g1_ref[...], be1_ref[...], eps)

    # ---- feed-forward (intermediate dense + GELU) ----
    ff = jnp.dot(h1.astype(jnp.bfloat16), wi_ref[...],
                 preferred_element_type=jnp.float32) + bi_ref[...]
    ff = _gelu_tanh(ff) if gelu_approx else _gelu_erf(ff)

    # ---- add & norm #2 (output dense + residual + layernorm) ----
    out = jnp.dot(ff.astype(jnp.bfloat16), wo_ref[...],
                  preferred_element_type=jnp.float32) + bo_ref[...]
    h2 = _layer_norm(h1 + out, g2_ref[...], be2_ref[...], eps)
    o_ref[0] = h2.astype(o_ref.dtype)


def bert_layer(hidden_states, attention_mask, params, *, num_heads, eps=1e-12,
               block_q=None, approx_gelu=None):
    """hidden_states: (B, S, H) f32; attention_mask: (B, S) f32 additive mask."""
    B, S, H = hidden_states.shape
    I = params["wi"].shape[1]
    assert H % num_heads == 0
    head_dim = H // num_heads

    kind = ""
    try:
        kind = jax.devices()[0].device_kind.lower()
    except Exception:
        pass
    is_v7 = "v7" in kind
    is_v6 = "v6" in kind

    # GELU: exact erf f32 by default / on v5e & unknown; tanh-approx (EUP) on v6e/v7x.
    if approx_gelu is None:
        approx_gelu = is_v6 or is_v7

    # Query-tile size: up to 512 on 128-MiB-VMEM chips (v5e/v6e), 256 on v7x.
    if block_q is not None:
        tq = block_q
    else:
        cap = 256 if is_v7 else 512
        tq = S
        if S > cap:
            for cand in (cap, 256, 128, 64, 32, 16, 8):
                if cand <= cap and S % cand == 0:
                    tq = cand
                    break
    assert S % tq == 0, "sequence length must be divisible by the query tile"

    bf16 = jnp.bfloat16
    wq = params["wq"].astype(bf16)
    wk = params["wk"].astype(bf16)
    wv = params["wv"].astype(bf16)
    wad = params["wad"].astype(bf16)
    wi = params["wi"].astype(bf16)
    wo = params["wo"].astype(bf16)
    f32 = lambda a: a.astype(jnp.float32)

    # Scoped VMEM limit from the chip's actual capacity; device-kind-aware fallback
    # (128 MiB for v5e/v6e, 64 MiB for v7x) instead of a blanket 64 MiB.
    try:
        vmem_cap = pltpu.get_tpu_info().vmem_capacity_bytes
    except Exception:
        vmem_cap = (64 if is_v7 else 128) * 1024 * 1024
    vmem_limit = min(int(vmem_cap * 0.9), 100 * 1024 * 1024)

    # Constant-index weight/bias/LN specs: DMA'd once and single-buffered
    # (pl.Buffered(1)) so resident weight VMEM is not doubled.
    def const_spec(shape):
        return pl.BlockSpec(shape, lambda b, q: (0, 0),
                            pipeline_mode=pl.Buffered(1))

    in_specs = [
        pl.BlockSpec((1, S, H), lambda b, q: (b, 0, 0)),   # x (full seq per batch elem)
        const_spec((B, S)),                                # additive attention mask (resident)
        const_spec((H, H)), const_spec((1, H)),            # query w, b
        const_spec((H, H)), const_spec((1, H)),            # key w, b
        const_spec((H, H)), const_spec((1, H)),            # value w, b
        const_spec((H, H)), const_spec((1, H)),            # attention_dense w, b
        const_spec((1, H)), const_spec((1, H)),            # ln1 gamma, beta
        const_spec((H, I)), const_spec((1, I)),            # interm_dense w, b
        const_spec((I, H)), const_spec((1, H)),            # out_dense w, b
        const_spec((1, H)), const_spec((1, H)),            # ln2 gamma, beta
    ]

    kernel = functools.partial(
        bert_layer_kernel, num_heads=num_heads, head_dim=head_dim, eps=eps,
        tq=tq, gelu_approx=approx_gelu)

    return pl.pallas_call(
        kernel,
        out_shape=jax.ShapeDtypeStruct((B, S, H), hidden_states.dtype),
        grid_spec=pltpu.PrefetchScalarGridSpec(
            num_scalar_prefetch=0,
            grid=(B, S // tq),
            in_specs=in_specs,
            out_specs=pl.BlockSpec((1, tq, H), lambda b, q: (b, q, 0)),
            scratch_shapes=[
                pltpu.VMEM((2, S, H), jnp.bfloat16),   # persistent K / V per batch element
                pltpu.VMEM((tq, H), jnp.bfloat16),     # per-tile pre-scaled Q
                pltpu.VMEM((tq, H), jnp.bfloat16),     # per-tile attention context
            ],
        ),
        compiler_params=pltpu.CompilerParams(
            dimension_semantics=("parallel", "arbitrary"),
            vmem_limit_bytes=vmem_limit,
        ),
    )(
        hidden_states, attention_mask,
        wq, f32(params["bq"]), wk, f32(params["bk"]), wv, f32(params["bv"]),
        wad, f32(params["bad"]), f32(params["g1"]), f32(params["be1"]),
        wi, f32(params["bi"]), wo, f32(params["bo"]),
        f32(params["g2"]), f32(params["be2"]),
    )


def bert_layer_ref(x, mask, p, *, num_heads, eps=1e-12):
    """Pure-JAX f32 reference mirroring the PyTorch forward (dropout = identity)."""
    B, S, H = x.shape
    hd = H // num_heads

    def proj(h, w, b):
        return h @ w + b  # weights stored pre-transposed as (in, out)

    def split_heads(t):
        return t.reshape(B, S, num_heads, hd).transpose(0, 2, 1, 3)

    q = split_heads(proj(x, p["wq"], p["bq"]))
    k = split_heads(proj(x, p["wk"], p["bk"]))
    v = split_heads(proj(x, p["wv"], p["bv"]))
    s = jnp.einsum("bhqd,bhkd->bhqk", q, k) / math.sqrt(hd)
    s = s + mask[:, None, None, :]
    a = jax.nn.softmax(s, axis=-1)
    ctx = jnp.einsum("bhqk,bhkd->bhqd", a, v).transpose(0, 2, 1, 3).reshape(B, S, H)

    def ln(t, g, b):
        m = jnp.mean(t, axis=-1, keepdims=True)
        var = jnp.mean(jnp.square(t - m), axis=-1, keepdims=True)
        return (t - m) * lax.rsqrt(var + eps) * g + b

    h1 = ln(x + (ctx @ p["wad"] + p["bad"]), p["g1"], p["be1"])
    ff = jax.nn.gelu(h1 @ p["wi"] + p["bi"], approximate=False)
    h2 = ln(h1 + (ff @ p["wo"] + p["bo"]), p["g2"], p["be2"])
    return h2


if __name__ == "__main__":
    # Small config: batch=2, seq=8, hidden=32, heads=4, intermediate=64.
    B, S, H, NH, I = 2, 8, 32, 4, 64
    eps = 1e-12

    key = jax.random.PRNGKey(0)
    ks = jax.random.split(key, 16)

    def lin(kw, kb, din, dout):
        # nn.Linear-style deterministic init; stored pre-transposed as (in, out).
        w = jax.random.normal(kw, (din, dout), jnp.float32) * 0.02
        b = jax.random.normal(kb, (1, dout), jnp.float32) * 0.02
        return w, b

    wq, bq = lin(ks[0], ks[1], H, H)
    wk, bk = lin(ks[2], ks[3], H, H)
    wv, bv = lin(ks[4], ks[5], H, H)
    wad, bad = lin(ks[6], ks[7], H, H)
    wi, bi = lin(ks[8], ks[9], H, I)
    wo, bo = lin(ks[10], ks[11], I, H)
    params = dict(
        wq=wq, bq=bq, wk=wk, bk=bk, wv=wv, bv=bv, wad=wad, bad=bad,
        g1=jnp.ones((1, H), jnp.float32), be1=jnp.zeros((1, H), jnp.float32),
        wi=wi, bi=bi, wo=wo, bo=bo,
        g2=jnp.ones((1, H), jnp.float32), be2=jnp.zeros((1, H), jnp.float32),
    )

    x = jax.random.normal(ks[12], (B, S, H), jnp.float32)
    # Additive attention mask: 0 = attend, -10000 = masked (last 2 tokens of batch 1).
    mask = jnp.zeros((B, S), jnp.float32).at[1, -2:].set(-10000.0)

    out = bert_layer(x, mask, params, num_heads=NH, eps=eps)
    out = jax.block_until_ready(out)

    ref = bert_layer_ref(x, mask, params, num_heads=NH, eps=eps)
    assert out.shape == (B, S, H)
    max_err = float(jnp.max(jnp.abs(out - ref)))
    # bf16 MXU operands (f32 accumulation) + approx softmax reciprocal (and
    # tanh-GELU on v6e/v7x) vs pure-f32 exact reference -> loose tolerance.
    assert jnp.allclose(out, ref, atol=2e-2, rtol=2e-2), max_err
    print("KERNEL_OK")
</pallas_src>

<mosaic_0001>
module attributes {stable_mosaic.version = 11 : i64} {
  func.func @bert_layer_kernel(%arg0: i32, %arg1: i32, %arg2: memref<1x8x32xf32, #tpu.memory_space<vmem>>, %arg3: memref<2x8xf32, #tpu.memory_space<vmem>>, %arg4: memref<32x32xbf16, #tpu.memory_space<vmem>>, %arg5: memref<1x32xf32, #tpu.memory_space<vmem>>, %arg6: memref<32x32xbf16, #tpu.memory_space<vmem>>, %arg7: memref<1x32xf32, #tpu.memory_space<vmem>>, %arg8: memref<32x32xbf16, #tpu.memory_space<vmem>>, %arg9: memref<1x32xf32, #tpu.memory_space<vmem>>, %arg10: memref<32x32xbf16, #tpu.memory_space<vmem>>, %arg11: memref<1x32xf32, #tpu.memory_space<vmem>>, %arg12: memref<1x32xf32, #tpu.memory_space<vmem>>, %arg13: memref<1x32xf32, #tpu.memory_space<vmem>>, %arg14: memref<32x64xbf16, #tpu.memory_space<vmem>>, %arg15: memref<1x64xf32, #tpu.memory_space<vmem>>, %arg16: memref<64x32xbf16, #tpu.memory_space<vmem>>, %arg17: memref<1x32xf32, #tpu.memory_space<vmem>>, %arg18: memref<1x32xf32, #tpu.memory_space<vmem>>, %arg19: memref<1x32xf32, #tpu.memory_space<vmem>>, %arg20: memref<1x8x32xf32, #tpu.memory_space<vmem>>, %arg21: memref<2x8x32xbf16, #tpu.memory_space<vmem>>, %arg22: memref<8x32xbf16, #tpu.memory_space<vmem>>, %arg23: memref<8x32xbf16, #tpu.memory_space<vmem>>) attributes {dimension_semantics = [#tpu.dimension_semantics<parallel>, #tpu.dimension_semantics<arbitrary>], iteration_bounds = array<i64: 2, 1>, scalar_prefetch = 0 : i64, scratch_operands = 3 : i64, tpu.core_type = #tpu.core_type<tc>, window_params = [{transform_indices = @transform_0, window_bounds = array<i64: 1, 8, 32>}, {pipeline_mode = #tpu.pipeline_mode<synchronous>, transform_indices = @transform_1, window_bounds = array<i64: 2, 8>}, {pipeline_mode = #tpu.pipeline_mode<synchronous>, transform_indices = @transform_2, window_bounds = array<i64: 32, 32>}, {pipeline_mode = #tpu.pipeline_mode<synchronous>, transform_indices = @transform_3, window_bounds = array<i64: 1, 32>}, {pipeline_mode = #tpu.pipeline_mode<synchronous>, transform_indices = @transform_4, window_bounds = array<i64: 32, 32>}, {pipeline_mode = #tpu.pipeline_mode<synchronous>, transform_indices = @transform_5, window_bounds = array<i64: 1, 32>}, {pipeline_mode = #tpu.pipeline_mode<synchronous>, transform_indices = @transform_6, window_bounds = array<i64: 32, 32>}, {pipeline_mode = #tpu.pipeline_mode<synchronous>, transform_indices = @transform_7, window_bounds = array<i64: 1, 32>}, {pipeline_mode = #tpu.pipeline_mode<synchronous>, transform_indices = @transform_8, window_bounds = array<i64: 32, 32>}, {pipeline_mode = #tpu.pipeline_mode<synchronous>, transform_indices = @transform_9, window_bounds = array<i64: 1, 32>}, {pipeline_mode = #tpu.pipeline_mode<synchronous>, transform_indices = @transform_10, window_bounds = array<i64: 1, 32>}, {pipeline_mode = #tpu.pipeline_mode<synchronous>, transform_indices = @transform_11, window_bounds = array<i64: 1, 32>}, {pipeline_mode = #tpu.pipeline_mode<synchronous>, transform_indices = @transform_12, window_bounds = array<i64: 32, 64>}, {pipeline_mode = #tpu.pipeline_mode<synchronous>, transform_indices = @transform_13, window_bounds = array<i64: 1, 64>}, {pipeline_mode = #tpu.pipeline_mode<synchronous>, transform_indices = @transform_14, window_bounds = array<i64: 64, 32>}, {pipeline_mode = #tpu.pipeline_mode<synchronous>, transform_indices = @transform_15, window_bounds = array<i64: 1, 32>}, {pipeline_mode = #tpu.pipeline_mode<synchronous>, transform_indices = @transform_16, window_bounds = array<i64: 1, 32>}, {pipeline_mode = #tpu.pipeline_mode<synchronous>, transform_indices = @transform_17, window_bounds = array<i64: 1, 32>}, {transform_indices = @transform_18, window_bounds = array<i64: 1, 8, 32>}]} {
    %c0_i32 = arith.constant 0 : i32
    %0 = arith.cmpi eq, %arg1, %c0_i32 : i32
    %1 = arith.extui %0 : i1 to i32
    %c0_i32_0 = arith.constant 0 : i32
    %2 = arith.cmpi ne, %1, %c0_i32_0 : i32
    scf.if %2 {
      %c0_99 = arith.constant 0 : index
      %c0_100 = arith.constant 0 : index
      %c0_101 = arith.constant 0 : index
      %185 = vector.load %arg2[%c0_99, %c0_100, %c0_101] : memref<1x8x32xf32, #tpu.memory_space<vmem>>, vector<1x8x32xf32>
      %186 = vector.shape_cast %185 : vector<1x8x32xf32> to vector<8x32xf32>
      %187 = arith.truncf %186 : vector<8x32xf32> to vector<8x32xbf16>
      %c0_102 = arith.constant 0 : index
      %c0_103 = arith.constant 0 : index
      %188 = vector.load %arg6[%c0_102, %c0_103] : memref<32x32xbf16, #tpu.memory_space<vmem>>, vector<32x32xbf16>
      %cst_104 = arith.constant dense<0.000000e+00> : vector<8x32xf32>
      %189 = tpu.matmul %187, %188, %cst_104 {dimension_numbers = #tpu.dot_dimension_numbers<[1], [0], [0], [1], [0, 0, 1, 1], [], []>} : vector<8x32xbf16>, vector<32x32xbf16>, vector<8x32xf32> -> vector<8x32xf32>
      %c0_105 = arith.constant 0 : index
      %c0_106 = arith.constant 0 : index
      %190 = vector.load %arg7[%c0_105, %c0_106] : memref<1x32xf32, #tpu.memory_space<vmem>>, vector<1x32xf32>
      %191 = vector.broadcast %190 : vector<1x32xf32> to vector<8x32xf32>
      %192 = arith.addf %189, %191 : vector<8x32xf32>
      %193 = arith.truncf %192 : vector<8x32xf32> to vector<8x32xbf16>
      %c0_107 = arith.constant 0 : index
      %c0_108 = arith.constant 0 : index
      %c0_109 = arith.constant 0 : index
      %194 = vector.load %arg21[%c0_107, %c0_108, %c0_109] : memref<2x8x32xbf16, #tpu.memory_space<vmem>>, vector<1x8x32xbf16>
      %195 = vector.shape_cast %194 : vector<1x8x32xbf16> to vector<8x32xbf16>
      %196 = vector.shape_cast %193 : vector<8x32xbf16> to vector<1x8x32xbf16>
      tpu.vector_store %arg21[%c0_107, %c0_108, %c0_109], %196 {strides = array<i32>} : memref<2x8x32xbf16, #tpu.memory_space<vmem>>, vector<1x8x32xbf16>,
      %c0_110 = arith.constant 0 : index
      %c0_111 = arith.constant 0 : index
      %197 = vector.load %arg8[%c0_110, %c0_111] : memref<32x32xbf16, #tpu.memory_space<vmem>>, vector<32x32xbf16>
      %cst_112 = arith.constant dense<0.000000e+00> : vector<8x32xf32>
      %198 = tpu.matmul %187, %197, %cst_112 {dimension_numbers = #tpu.dot_dimension_numbers<[1], [0], [0], [1], [0, 0, 1, 1], [], []>} : vector<8x32xbf16>, vector<32x32xbf16>, vector<8x32xf32> -> vector<8x32xf32>
      %c0_113 = arith.constant 0 : index
      %c0_114 = arith.constant 0 : index
      %199 = vector.load %arg9[%c0_113, %c0_114] : memref<1x32xf32, #tpu.memory_space<vmem>>, vector<1x32xf32>
      %200 = vector.broadcast %199 : vector<1x32xf32> to vector<8x32xf32>
      %201 = arith.addf %198, %200 : vector<8x32xf32>
      %202 = arith.truncf %201 : vector<8x32xf32> to vector<8x32xbf16>
      %c1_115 = arith.constant 1 : index
      %c0_116 = arith.constant 0 : index
      %c0_117 = arith.constant 0 : index
      %203 = vector.load %arg21[%c1_115, %c0_116, %c0_117] : memref<2x8x32xbf16, #tpu.memory_space<vmem>>, vector<1x8x32xbf16>
      %204 = vector.shape_cast %203 : vector<1x8x32xbf16> to vector<8x32xbf16>
      %205 = vector.shape_cast %202 : vector<8x32xbf16> to vector<1x8x32xbf16>
      tpu.vector_store %arg21[%c1_115, %c0_116, %c0_117], %205 {strides = array<i32>} : memref<2x8x32xbf16, #tpu.memory_space<vmem>>, vector<1x8x32xbf16>,
    } else {
    }
    %c8_i32 = arith.constant 8 : i32
    %3 = arith.muli %arg1, %c8_i32 : i32
    %4 = tpu.assume_multiple %3, 8 : i32
    %c0 = arith.constant 0 : index
    %5 = arith.index_cast %4 : i32 to index
    %c0_1 = arith.constant 0 : index
    %6 = vector.load %arg2[%c0, %5, %c0_1] : memref<1x8x32xf32, #tpu.memory_space<vmem>>, vector<1x8x32xf32>
    %7 = vector.shape_cast %6 : vector<1x8x32xf32> to vector<8x32xf32>
    %8 = arith.truncf %7 : vector<8x32xf32> to vector<8x32xbf16>
    %c0_2 = arith.constant 0 : index
    %c0_3 = arith.constant 0 : index
    %9 = vector.load %arg4[%c0_2, %c0_3] : memref<32x32xbf16, #tpu.memory_space<vmem>>, vector<32x32xbf16>
    %cst = arith.constant dense<0.000000e+00> : vector<8x32xf32>
    %10 = tpu.matmul %8, %9, %cst {dimension_numbers = #tpu.dot_dimension_numbers<[1], [0], [0], [1], [0, 0, 1, 1], [], []>} : vector<8x32xbf16>, vector<32x32xbf16>, vector<8x32xf32> -> vector<8x32xf32>
    %c0_4 = arith.constant 0 : index
    %c0_5 = arith.constant 0 : index
    %11 = vector.load %arg5[%c0_4, %c0_5] : memref<1x32xf32, #tpu.memory_space<vmem>>, vector<1x32xf32>
    %12 = vector.broadcast %11 : vector<1x32xf32> to vector<8x32xf32>
    %13 = arith.addf %10, %12 : vector<8x32xf32>
    %cst_6 = arith.constant 0.353553385 : f32
    %14 = vector.broadcast %cst_6 : f32 to vector<8x32xf32>
    %15 = arith.mulf %13, %14 : vector<8x32xf32>
    %16 = arith.truncf %15 : vector<8x32xf32> to vector<8x32xbf16>
    %c0_7 = arith.constant 0 : index
    %c0_8 = arith.constant 0 : index
    %17 = vector.load %arg22[%c0_7, %c0_8] : memref<8x32xbf16, #tpu.memory_space<vmem>>, vector<8x32xbf16>
    tpu.vector_store %arg22[%c0_7, %c0_8], %16 {strides = array<i32>} : memref<8x32xbf16, #tpu.memory_space<vmem>>, vector<8x32xbf16>,
    %18 = arith.index_cast %arg0 : i32 to index
    %c0_9 = arith.constant 0 : index
    %19 = vector.load %arg3[%18, %c0_9] : memref<2x8xf32, #tpu.memory_space<vmem>>, vector<1x8xf32>
    %c0_10 = arith.constant 0 : index
    %c0_11 = arith.constant 0 : index
    %20 = vector.load %arg22[%c0_10, %c0_11] : memref<8x32xbf16, #tpu.memory_space<vmem>>, vector<8x8xbf16>
    %c0_12 = arith.constant 0 : index
    %c0_13 = arith.constant 0 : index
    %c0_14 = arith.constant 0 : index
    %21 = vector.load %arg21[%c0_12, %c0_13, %c0_14] : memref<2x8x32xbf16, #tpu.memory_space<vmem>>, vector<1x8x8xbf16>
    %22 = vector.shape_cast %21 : vector<1x8x8xbf16> to vector<8x8xbf16>
    %c1 = arith.constant 1 : index
    %c0_15 = arith.constant 0 : index
    %c0_16 = arith.constant 0 : index
    %23 = vector.load %arg21[%c1, %c0_15, %c0_16] : memref<2x8x32xbf16, #tpu.memory_space<vmem>>, vector<1x8x8xbf16>
    %24 = vector.shape_cast %23 : vector<1x8x8xbf16> to vector<8x8xbf16>
    %cst_17 = arith.constant dense<0.000000e+00> : vector<8x8xf32>
    %25 = tpu.matmul %20, %22, %cst_17 {dimension_numbers = #tpu.dot_dimension_numbers<[1], [1], [0], [0], [0, 0, 1, 0], [], []>} : vector<8x8xbf16>, vector<8x8xbf16>, vector<8x8xf32> -> vector<8x8xf32>
    %26 = vector.broadcast %19 : vector<1x8xf32> to vector<8x8xf32>
    %27 = arith.addf %25, %26 : vector<8x8xf32>
    %cst_18 = arith.constant dense<0xFF800000> : vector<8xf32>
    %28 = vector.multi_reduction <maximumf>, %27, %cst_18 [1] : vector<8x8xf32> to vector<8xf32>
    %29 = vector.shape_cast %28 : vector<8xf32> to vector<8x1xf32>
    %30 = vector.broadcast %29 : vector<8x1xf32> to vector<8x8xf32>
    %31 = arith.subf %27, %30 : vector<8x8xf32>
    %32 = math.exp %31 : vector<8x8xf32>
    %cst_19 = arith.constant dense<0.000000e+00> : vector<8xf32>
    %33 = vector.multi_reduction <add>, %32, %cst_19 [1] : vector<8x8xf32> to vector<8xf32>
    %34 = vector.shape_cast %33 : vector<8xf32> to vector<8x1xf32>
    %35 = tpu.reciprocal %34 {approx = true} : vector<8x1xf32> -> vector<8x1xf32>
    %36 = vector.broadcast %35 : vector<8x1xf32> to vector<8x8xf32>
    %37 = arith.mulf %32, %36 : vector<8x8xf32>
    %38 = arith.truncf %37 : vector<8x8xf32> to vector<8x8xbf16>
    %cst_20 = arith.constant dense<0.000000e+00> : vector<8x8xf32>
    %39 = tpu.matmul %38, %24, %cst_20 {dimension_numbers = #tpu.dot_dimension_numbers<[1], [0], [0], [1], [0, 0, 1, 1], [], []>} : vector<8x8xbf16>, vector<8x8xbf16>, vector<8x8xf32> -> vector<8x8xf32>
    %c0_21 = arith.constant 0 : index
    %c8 = arith.constant 8 : index
    %40 = vector.load %arg22[%c0_21, %c8] : memref<8x32xbf16, #tpu.memory_space<vmem>>, vector<8x8xbf16>
    %c0_22 = arith.constant 0 : index
    %c0_23 = arith.constant 0 : index
    %c8_24 = arith.constant 8 : index
    %41 = vector.load %arg21[%c0_22, %c0_23, %c8_24] : memref<2x8x32xbf16, #tpu.memory_space<vmem>>, vector<1x8x8xbf16>
    %42 = vector.shape_cast %41 : vector<1x8x8xbf16> to vector<8x8xbf16>
    %c1_25 = arith.constant 1 : index
    %c0_26 = arith.constant 0 : index
    %c8_27 = arith.constant 8 : index
    %43 = vector.load %arg21[%c1_25, %c0_26, %c8_27] : memref<2x8x32xbf16, #tpu.memory_space<vmem>>, vector<1x8x8xbf16>
    %44 = vector.shape_cast %43 : vector<1x8x8xbf16> to vector<8x8xbf16>
    %cst_28 = arith.constant dense<0.000000e+00> : vector<8x8xf32>
    %45 = tpu.matmul %40, %42, %cst_28 {dimension_numbers = #tpu.dot_dimension_numbers<[1], [1], [0], [0], [0, 0, 1, 0], [], []>} : vector<8x8xbf16>, vector<8x8xbf16>, vector<8x8xf32> -> vector<8x8xf32>
    %46 = vector.broadcast %19 : vector<1x8xf32> to vector<8x8xf32>
    %47 = arith.addf %45, %46 : vector<8x8xf32>
    %cst_29 = arith.constant dense<0xFF800000> : vector<8xf32>
    %48 = vector.multi_reduction <maximumf>, %47, %cst_29 [1] : vector<8x8xf32> to vector<8xf32>
    %49 = vector.shape_cast %48 : vector<8xf32> to vector<8x1xf32>
    %50 = vector.broadcast %49 : vector<8x1xf32> to vector<8x8xf32>
    %51 = arith.subf %47, %50 : vector<8x8xf32>
    %52 = math.exp %51 : vector<8x8xf32>
    %cst_30 = arith.constant dense<0.000000e+00> : vector<8xf32>
    %53 = vector.multi_reduction <add>, %52, %cst_30 [1] : vector<8x8xf32> to vector<8xf32>
    %54 = vector.shape_cast %53 : vector<8xf32> to vector<8x1xf32>
    %55 = tpu.reciprocal %54 {approx = true} : vector<8x1xf32> -> vector<8x1xf32>
    %56 = vector.broadcast %55 : vector<8x1xf32> to vector<8x8xf32>
    %57 = arith.mulf %52, %56 : vector<8x8xf32>
    %58 = arith.truncf %57 : vector<8x8xf32> to vector<8x8xbf16>
    %cst_31 = arith.constant dense<0.000000e+00> : vector<8x8xf32>
    %59 = tpu.matmul %58, %44, %cst_31 {dimension_numbers = #tpu.dot_dimension_numbers<[1], [0], [0], [1], [0, 0, 1, 1], [], []>} : vector<8x8xbf16>, vector<8x8xbf16>, vector<8x8xf32> -> vector<8x8xf32>
    %60 = tpu.concatenate %39, %59 in 1 : vector<8x8xf32>, vector<8x8xf32> -> vector<8x16xf32>
    %61 = arith.truncf %60 : vector<8x16xf32> to vector<8x16xbf16>
    %c0_32 = arith.constant 0 : index
    %c0_33 = arith.constant 0 : index
    %62 = vector.load %arg23[%c0_32, %c0_33] : memref<8x32xbf16, #tpu.memory_space<vmem>>, vector<8x16xbf16>
    tpu.vector_store %arg23[%c0_32, %c0_33], %61 {strides = array<i32>} : memref<8x32xbf16, #tpu.memory_space<vmem>>, vector<8x16xbf16>,
    %c0_34 = arith.constant 0 : index
    %c16 = arith.constant 16 : index
    %63 = vector.load %arg22[%c0_34, %c16] : memref<8x32xbf16, #tpu.memory_space<vmem>>, vector<8x8xbf16>
    %c0_35 = arith.constant 0 : index
    %c0_36 = arith.constant 0 : index
    %c16_37 = arith.constant 16 : index
    %64 = vector.load %arg21[%c0_35, %c0_36, %c16_37] : memref<2x8x32xbf16, #tpu.memory_space<vmem>>, vector<1x8x8xbf16>
    %65 = vector.shape_cast %64 : vector<1x8x8xbf16> to vector<8x8xbf16>
    %c1_38 = arith.constant 1 : index
    %c0_39 = arith.constant 0 : index
    %c16_40 = arith.constant 16 : index
    %66 = vector.load %arg21[%c1_38, %c0_39, %c16_40] : memref<2x8x32xbf16, #tpu.memory_space<vmem>>, vector<1x8x8xbf16>
    %67 = vector.shape_cast %66 : vector<1x8x8xbf16> to vector<8x8xbf16>
    %cst_41 = arith.constant dense<0.000000e+00> : vector<8x8xf32>
    %68 = tpu.matmul %63, %65, %cst_41 {dimension_numbers = #tpu.dot_dimension_numbers<[1], [1], [0], [0], [0, 0, 1, 0], [], []>} : vector<8x8xbf16>, vector<8x8xbf16>, vector<8x8xf32> -> vector<8x8xf32>
    %69 = vector.broadcast %19 : vector<1x8xf32> to vector<8x8xf32>
    %70 = arith.addf %68, %69 : vector<8x8xf32>
    %cst_42 = arith.constant dense<0xFF800000> : vector<8xf32>
    %71 = vector.multi_reduction <maximumf>, %70, %cst_42 [1] : vector<8x8xf32> to vector<8xf32>
    %72 = vector.shape_cast %71 : vector<8xf32> to vector<8x1xf32>
    %73 = vector.broadcast %72 : vector<8x1xf32> to vector<8x8xf32>
    %74 = arith.subf %70, %73 : vector<8x8xf32>
    %75 = math.exp %74 : vector<8x8xf32>
    %cst_43 = arith.constant dense<0.000000e+00> : vector<8xf32>
    %76 = vector.multi_reduction <add>, %75, %cst_43 [1] : vector<8x8xf32> to vector<8xf32>
    %77 = vector.shape_cast %76 : vector<8xf32> to vector<8x1xf32>
    %78 = tpu.reciprocal %77 {approx = true} : vector<8x1xf32> -> vector<8x1xf32>
    %79 = vector.broadcast %78 : vector<8x1xf32> to vector<8x8xf32>
    %80 = arith.mulf %75, %79 : vector<8x8xf32>
    %81 = arith.truncf %80 : vector<8x8xf32> to vector<8x8xbf16>
    %cst_44 = arith.constant dense<0.000000e+00> : vector<8x8xf32>
    %82 = tpu.matmul %81, %67, %cst_44 {dimension_numbers = #tpu.dot_dimension_numbers<[1], [0], [0], [1], [0, 0, 1, 1], [], []>} : vector<8x8xbf16>, vector<8x8xbf16>, vector<8x8xf32> -> vector<8x8xf32>
    %c0_45 = arith.constant 0 : index
    %c24 = arith.constant 24 : index
    %83 = vector.load %arg22[%c0_45, %c24] : memref<8x32xbf16, #tpu.memory_space<vmem>>, vector<8x8xbf16>
    %c0_46 = arith.constant 0 : index
    %c0_47 = arith.constant 0 : index
    %c24_48 = arith.constant 24 : index
    %84 = vector.load %arg21[%c0_46, %c0_47, %c24_48] : memref<2x8x32xbf16, #tpu.memory_space<vmem>>, vector<1x8x8xbf16>
    %85 = vector.shape_cast %84 : vector<1x8x8xbf16> to vector<8x8xbf16>
    %c1_49 = arith.constant 1 : index
    %c0_50 = arith.constant 0 : index
    %c24_51 = arith.constant 24 : index
    %86 = vector.load %arg21[%c1_49, %c0_50, %c24_51] : memref<2x8x32xbf16, #tpu.memory_space<vmem>>, vector<1x8x8xbf16>
    %87 = vector.shape_cast %86 : vector<1x8x8xbf16> to vector<8x8xbf16>
    %cst_52 = arith.constant dense<0.000000e+00> : vector<8x8xf32>
    %88 = tpu.matmul %83, %85, %cst_52 {dimension_numbers = #tpu.dot_dimension_numbers<[1], [1], [0], [0], [0, 0, 1, 0], [], []>} : vector<8x8xbf16>, vector<8x8xbf16>, vector<8x8xf32> -> vector<8x8xf32>
    %89 = vector.broadcast %19 : vector<1x8xf32> to vector<8x8xf32>
    %90 = arith.addf %88, %89 : vector<8x8xf32>
    %cst_53 = arith.constant dense<0xFF800000> : vector<8xf32>
    %91 = vector.multi_reduction <maximumf>, %90, %cst_53 [1] : vector<8x8xf32> to vector<8xf32>
    %92 = vector.shape_cast %91 : vector<8xf32> to vector<8x1xf32>
    %93 = vector.broadcast %92 : vector<8x1xf32> to vector<8x8xf32>
    %94 = arith.subf %90, %93 : vector<8x8xf32>
    %95 = math.exp %94 : vector<8x8xf32>
    %cst_54 = arith.constant dense<0.000000e+00> : vector<8xf32>
    %96 = vector.multi_reduction <add>, %95, %cst_54 [1] : vector<8x8xf32> to vector<8xf32>
    %97 = vector.shape_cast %96 : vector<8xf32> to vector<8x1xf32>
    %98 = tpu.reciprocal %97 {approx = true} : vector<8x1xf32> -> vector<8x1xf32>
    %99 = vector.broadcast %98 : vector<8x1xf32> to vector<8x8xf32>
    %100 = arith.mulf %95, %99 : vector<8x8xf32>
    %101 = arith.truncf %100 : vector<8x8xf32> to vector<8x8xbf16>
    %cst_55 = arith.constant dense<0.000000e+00> : vector<8x8xf32>
    %102 = tpu.matmul %101, %87, %cst_55 {dimension_numbers = #tpu.dot_dimension_numbers<[1], [0], [0], [1], [0, 0, 1, 1], [], []>} : vector<8x8xbf16>, vector<8x8xbf16>, vector<8x8xf32> -> vector<8x8xf32>
    %103 = tpu.concatenate %82, %102 in 1 : vector<8x8xf32>, vector<8x8xf32> -> vector<8x16xf32>
    %104 = arith.truncf %103 : vector<8x16xf32> to vector<8x16xbf16>
    %c0_56 = arith.constant 0 : index
    %c16_57 = arith.constant 16 : index
    %105 = vector.load %arg23[%c0_56, %c16_57] : memref<8x32xbf16, #tpu.memory_space<vmem>>, vector<8x16xbf16>
    tpu.vector_store %arg23[%c0_56, %c16_57], %104 {strides = array<i32>} : memref<8x32xbf16, #tpu.memory_space<vmem>>, vector<8x16xbf16>,
    %c0_58 = arith.constant 0 : index
    %c0_59 = arith.constant 0 : index
    %106 = vector.load %arg23[%c0_58, %c0_59] : memref<8x32xbf16, #tpu.memory_space<vmem>>, vector<8x32xbf16>
    %c0_60 = arith.constant 0 : index
    %c0_61 = arith.constant 0 : index
    %107 = vector.load %arg10[%c0_60, %c0_61] : memref<32x32xbf16, #tpu.memory_space<vmem>>, vector<32x32xbf16>
    %cst_62 = arith.constant dense<0.000000e+00> : vector<8x32xf32>
    %108 = tpu.matmul %106, %107, %cst_62 {dimension_numbers = #tpu.dot_dimension_numbers<[1], [0], [0], [1], [0, 0, 1, 1], [], []>} : vector<8x32xbf16>, vector<32x32xbf16>, vector<8x32xf32> -> vector<8x32xf32>
    %c0_63 = arith.constant 0 : index
    %c0_64 = arith.constant 0 : index
    %109 = vector.load %arg11[%c0_63, %c0_64] : memref<1x32xf32, #tpu.memory_space<vmem>>, vector<1x32xf32>
    %110 = vector.broadcast %109 : vector<1x32xf32> to vector<8x32xf32>
    %111 = arith.addf %108, %110 : vector<8x32xf32>
    %112 = arith.addf %7, %111 : vector<8x32xf32>
    %c0_65 = arith.constant 0 : index
    %c0_66 = arith.constant 0 : index
    %113 = vector.load %arg12[%c0_65, %c0_66] : memref<1x32xf32, #tpu.memory_space<vmem>>, vector<1x32xf32>
    %c0_67 = arith.constant 0 : index
    %c0_68 = arith.constant 0 : index
    %114 = vector.load %arg13[%c0_67, %c0_68] : memref<1x32xf32, #tpu.memory_space<vmem>>, vector<1x32xf32>
    %cst_69 = arith.constant dense<0.000000e+00> : vector<8xf32>
    %115 = vector.multi_reduction <add>, %112, %cst_69 [1] : vector<8x32xf32> to vector<8xf32>
    %116 = vector.shape_cast %115 : vector<8xf32> to vector<8x1xf32>
    %cst_70 = arith.constant 3.200000e+01 : f32
    %117 = vector.broadcast %cst_70 : f32 to vector<8x1xf32>
    %118 = arith.divf %116, %117 : vector<8x1xf32>
    %119 = vector.broadcast %118 : vector<8x1xf32> to vector<8x32xf32>
    %120 = arith.subf %112, %119 : vector<8x32xf32>
    %121 = arith.mulf %120, %120 : vector<8x32xf32>
    %cst_71 = arith.constant dense<0.000000e+00> : vector<8xf32>
    %122 = vector.multi_reduction <add>, %121, %cst_71 [1] : vector<8x32xf32> to vector<8xf32>
    %123 = vector.shape_cast %122 : vector<8xf32> to vector<8x1xf32>
    %cst_72 = arith.constant 3.200000e+01 : f32
    %124 = vector.broadcast %cst_72 : f32 to vector<8x1xf32>
    %125 = arith.divf %123, %124 : vector<8x1xf32>
    %126 = vector.broadcast %118 : vector<8x1xf32> to vector<8x32xf32>
    %127 = arith.subf %112, %126 : vector<8x32xf32>
    %cst_73 = arith.constant 9.99999996E-13 : f32
    %128 = vector.broadcast %cst_73 : f32 to vector<8x1xf32>
    %129 = arith.addf %125, %128 : vector<8x1xf32>
    %130 = math.rsqrt %129 : vector<8x1xf32>
    %131 = vector.broadcast %130 : vector<8x1xf32> to vector<8x32xf32>
    %132 = arith.mulf %127, %131 : vector<8x32xf32>
    %133 = vector.broadcast %113 : vector<1x32xf32> to vector<8x32xf32>
    %134 = arith.mulf %132, %133 : vector<8x32xf32>
    %135 = vector.broadcast %114 : vector<1x32xf32> to vector<8x32xf32>
    %136 = arith.addf %134, %135 : vector<8x32xf32>
    %137 = arith.truncf %136 : vector<8x32xf32> to vector<8x32xbf16>
    %c0_74 = arith.constant 0 : index
    %c0_75 = arith.constant 0 : index
    %138 = vector.load %arg14[%c0_74, %c0_75] : memref<32x64xbf16, #tpu.memory_space<vmem>>, vector<32x64xbf16>
    %cst_76 = arith.constant dense<0.000000e+00> : vector<8x64xf32>
    %139 = tpu.matmul %137, %138, %cst_76 {dimension_numbers = #tpu.dot_dimension_numbers<[1], [0], [0], [1], [0, 0, 1, 1], [], []>} : vector<8x32xbf16>, vector<32x64xbf16>, vector<8x64xf32> -> vector<8x64xf32>
    %c0_77 = arith.constant 0 : index
    %c0_78 = arith.constant 0 : index
    %140 = vector.load %arg15[%c0_77, %c0_78] : memref<1x64xf32, #tpu.memory_space<vmem>>, vector<1x64xf32>
    %141 = vector.broadcast %140 : vector<1x64xf32> to vector<8x64xf32>
    %142 = arith.addf %139, %141 : vector<8x64xf32>
    %cst_79 = arith.constant 5.000000e-01 : f32
    %143 = vector.broadcast %cst_79 : f32 to vector<8x64xf32>
    %144 = arith.mulf %143, %142 : vector<8x64xf32>
    %cst_80 = arith.constant 0.707106769 : f32
    %145 = vector.broadcast %cst_80 : f32 to vector<8x64xf32>
    %146 = arith.mulf %142, %145 : vector<8x64xf32>
    %147 = math.erf %146 : vector<8x64xf32>
    %cst_81 = arith.constant 1.000000e+00 : f32
    %148 = vector.broadcast %cst_81 : f32 to vector<8x64xf32>
    %149 = arith.addf %148, %147 : vector<8x64xf32>
    %150 = arith.mulf %144, %149 : vector<8x64xf32>
    %151 = arith.truncf %150 : vector<8x64xf32> to vector<8x64xbf16>
    %c0_82 = arith.constant 0 : index
    %c0_83 = arith.constant 0 : index
    %152 = vector.load %arg16[%c0_82, %c0_83] : memref<64x32xbf16, #tpu.memory_space<vmem>>, vector<64x32xbf16>
    %cst_84 = arith.constant dense<0.000000e+00> : vector<8x32xf32>
    %153 = tpu.matmul %151, %152, %cst_84 {dimension_numbers = #tpu.dot_dimension_numbers<[1], [0], [0], [1], [0, 0, 1, 1], [], []>} : vector<8x64xbf16>, vector<64x32xbf16>, vector<8x32xf32> -> vector<8x32xf32>
    %c0_85 = arith.constant 0 : index
    %c0_86 = arith.constant 0 : index
    %154 = vector.load %arg17[%c0_85, %c0_86] : memref<1x32xf32, #tpu.memory_space<vmem>>, vector<1x32xf32>
    %155 = vector.broadcast %154 : vector<1x32xf32> to vector<8x32xf32>
    %156 = arith.addf %153, %155 : vector<8x32xf32>
    %157 = arith.addf %136, %156 : vector<8x32xf32>
    %c0_87 = arith.constant 0 : index
    %c0_88 = arith.constant 0 : index
    %158 = vector.load %arg18[%c0_87, %c0_88] : memref<1x32xf32, #tpu.memory_space<vmem>>, vector<1x32xf32>
    %c0_89 = arith.constant 0 : index
    %c0_90 = arith.constant 0 : index
    %159 = vector.load %arg19[%c0_89, %c0_90] : memref<1x32xf32, #tpu.memory_space<vmem>>, vector<1x32xf32>
    %cst_91 = arith.constant dense<0.000000e+00> : vector<8xf32>
    %160 = vector.multi_reduction <add>, %157, %cst_91 [1] : vector<8x32xf32> to vector<8xf32>
    %161 = vector.shape_cast %160 : vector<8xf32> to vector<8x1xf32>
    %cst_92 = arith.constant 3.200000e+01 : f32
    %162 = vector.broadcast %cst_92 : f32 to vector<8x1xf32>
    %163 = arith.divf %161, %162 : vector<8x1xf32>
    %164 = vector.broadcast %163 : vector<8x1xf32> to vector<8x32xf32>
    %165 = arith.subf %157, %164 : vector<8x32xf32>
    %166 = arith.mulf %165, %165 : vector<8x32xf32>
    %cst_93 = arith.constant dense<0.000000e+00> : vector<8xf32>
    %167 = vector.multi_reduction <add>, %166, %cst_93 [1] : vector<8x32xf32> to vector<8xf32>
    %168 = vector.shape_cast %167 : vector<8xf32> to vector<8x1xf32>
    %cst_94 = arith.constant 3.200000e+01 : f32
    %169 = vector.broadcast %cst_94 : f32 to vector<8x1xf32>
    %170 = arith.divf %168, %169 : vector<8x1xf32>
    %171 = vector.broadcast %163 : vector<8x1xf32> to vector<8x32xf32>
    %172 = arith.subf %157, %171 : vector<8x32xf32>
    %cst_95 = arith.constant 9.99999996E-13 : f32
    %173 = vector.broadcast %cst_95 : f32 to vector<8x1xf32>
    %174 = arith.addf %170, %173 : vector<8x1xf32>
    %175 = math.rsqrt %174 : vector<8x1xf32>
    %176 = vector.broadcast %175 : vector<8x1xf32> to vector<8x32xf32>
    %177 = arith.mulf %172, %176 : vector<8x32xf32>
    %178 = vector.broadcast %158 : vector<1x32xf32> to vector<8x32xf32>
    %179 = arith.mulf %177, %178 : vector<8x32xf32>
    %180 = vector.broadcast %159 : vector<1x32xf32> to vector<8x32xf32>
    %181 = arith.addf %179, %180 : vector<8x32xf32>
    %c0_96 = arith.constant 0 : index
    %c0_97 = arith.constant 0 : index
    %c0_98 = arith.constant 0 : index
    %182 = vector.load %arg20[%c0_96, %c0_97, %c0_98] : memref<1x8x32xf32, #tpu.memory_space<vmem>>, vector<1x8x32xf32>
    %183 = vector.shape_cast %182 : vector<1x8x32xf32> to vector<8x32xf32>
    %184 = vector.shape_cast %181 : vector<8x32xf32> to vector<1x8x32xf32>
    tpu.vector_store %arg20[%c0_96, %c0_97, %c0_98], %184 {strides = array<i32>} : memref<1x8x32xf32, #tpu.memory_space<vmem>>, vector<1x8x32xf32>,
    return
  }
  func.func @transform_0(%arg0: i32, %arg1: i32) -> (i32, i32, i32) {
    %c0_i32 = arith.constant 0 : i32
    %c0_i32_0 = arith.constant 0 : i32
    %c0_i32_1 = arith.constant 0 : i32
    return %arg0, %c0_i32, %c0_i32_0 : i32, i32, i32
  }
  func.func @transform_1(%arg0: i32, %arg1: i32) -> (i32, i32) {
    %c0_i32 = arith.constant 0 : i32
    %c0_i32_0 = arith.constant 0 : i32
    %c0_i32_1 = arith.constant 0 : i32
    return %c0_i32, %c0_i32_0 : i32, i32
  }
  func.func @transform_2(%arg0: i32, %arg1: i32) -> (i32, i32) {
    %c0_i32 = arith.constant 0 : i32
    %c0_i32_0 = arith.constant 0 : i32
    %c0_i32_1 = arith.constant 0 : i32
    return %c0_i32, %c0_i32_0 : i32, i32
  }
  func.func @transform_3(%arg0: i32, %arg1: i32) -> (i32, i32) {
    %c0_i32 = arith.constant 0 : i32
    %c0_i32_0 = arith.constant 0 : i32
    %c0_i32_1 = arith.constant 0 : i32
    return %c0_i32, %c0_i32_0 : i32, i32
  }
  func.func @transform_4(%arg0: i32, %arg1: i32) -> (i32, i32) {
    %c0_i32 = arith.constant 0 : i32
    %c0_i32_0 = arith.constant 0 : i32
    %c0_i32_1 = arith.constant 0 : i32
    return %c0_i32, %c0_i32_0 : i32, i32
  }
  func.func @transform_5(%arg0: i32, %arg1: i32) -> (i32, i32) {
    %c0_i32 = arith.constant 0 : i32
    %c0_i32_0 = arith.constant 0 : i32
    %c0_i32_1 = arith.constant 0 : i32
    return %c0_i32, %c0_i32_0 : i32, i32
  }
  func.func @transform_6(%arg0: i32, %arg1: i32) -> (i32, i32) {
    %c0_i32 = arith.constant 0 : i32
    %c0_i32_0 = arith.constant 0 : i32
    %c0_i32_1 = arith.constant 0 : i32
    return %c0_i32, %c0_i32_0 : i32, i32
  }
  func.func @transform_7(%arg0: i32, %arg1: i32) -> (i32, i32) {
    %c0_i32 = arith.constant 0 : i32
    %c0_i32_0 = arith.constant 0 : i32
    %c0_i32_1 = arith.constant 0 : i32
    return %c0_i32, %c0_i32_0 : i32, i32
  }
  func.func @transform_8(%arg0: i32, %arg1: i32) -> (i32, i32) {
    %c0_i32 = arith.constant 0 : i32
    %c0_i32_0 = arith.constant 0 : i32
    %c0_i32_1 = arith.constant 0 : i32
    return %c0_i32, %c0_i32_0 : i32, i32
  }
  func.func @transform_9(%arg0: i32, %arg1: i32) -> (i32, i32) {
    %c0_i32 = arith.constant 0 : i32
    %c0_i32_0 = arith.constant 0 : i32
    %c0_i32_1 = arith.constant 0 : i32
    return %c0_i32, %c0_i32_0 : i32, i32
  }
  func.func @transform_10(%arg0: i32, %arg1: i32) -> (i32, i32) {
    %c0_i32 = arith.constant 0 : i32
    %c0_i32_0 = arith.constant 0 : i32
    %c0_i32_1 = arith.constant 0 : i32
    return %c0_i32, %c0_i32_0 : i32, i32
  }
  func.func @transform_11(%arg0: i32, %arg1: i32) -> (i32, i32) {
    %c0_i32 = arith.constant 0 : i32
    %c0_i32_0 = arith.constant 0 : i32
    %c0_i32_1 = arith.constant 0 : i32
    return %c0_i32, %c0_i32_0 : i32, i32
  }
  func.func @transform_12(%arg0: i32, %arg1: i32) -> (i32, i32) {
    %c0_i32 = arith.constant 0 : i32
    %c0_i32_0 = arith.constant 0 : i32
    %c0_i32_1 = arith.constant 0 : i32
    return %c0_i32, %c0_i32_0 : i32, i32
  }
  func.func @transform_13(%arg0: i32, %arg1: i32) -> (i32, i32) {
    %c0_i32 = arith.constant 0 : i32
    %c0_i32_0 = arith.constant 0 : i32
    %c0_i32_1 = arith.constant 0 : i32
    return %c0_i32, %c0_i32_0 : i32, i32
  }
  func.func @transform_14(%arg0: i32, %arg1: i32) -> (i32, i32) {
    %c0_i32 = arith.constant 0 : i32
    %c0_i32_0 = arith.constant 0 : i32
    %c0_i32_1 = arith.constant 0 : i32
    return %c0_i32, %c0_i32_0 : i32, i32
  }
  func.func @transform_15(%arg0: i32, %arg1: i32) -> (i32, i32) {
    %c0_i32 = arith.constant 0 : i32
    %c0_i32_0 = arith.constant 0 : i32
    %c0_i32_1 = arith.constant 0 : i32
    return %c0_i32, %c0_i32_0 : i32, i32
  }
  func.func @transform_16(%arg0: i32, %arg1: i32) -> (i32, i32) {
    %c0_i32 = arith.constant 0 : i32
    %c0_i32_0 = arith.constant 0 : i32
    %c0_i32_1 = arith.constant 0 : i32
    return %c0_i32, %c0_i32_0 : i32, i32
  }
  func.func @transform_17(%arg0: i32, %arg1: i32) -> (i32, i32) {
    %c0_i32 = arith.constant 0 : i32
    %c0_i32_0 = arith.constant 0 : i32
    %c0_i32_1 = arith.constant 0 : i32
    return %c0_i32, %c0_i32_0 : i32, i32
  }
  func.func @transform_18(%arg0: i32, %arg1: i32) -> (i32, i32, i32) {
    %c0_i32 = arith.constant 0 : i32
    %c0_i32_0 = arith.constant 0 : i32
    return %arg0, %arg1, %c0_i32 : i32, i32, i32
  }
}

</mosaic_0001>

<bundles_post_ra>
// kernel: tpu_custom_call.1
= control target key start
LH: loop header
LB: loop body
LE: loop exit
PB: predicated region body
PF: predicated region fallthrough
CT: control target
= control target key end

     0   :  { %s2942_s0 = inlined_call_operand.vmem [shape: f32[2,8,32], index: 0, kind: input, shape index: {}]   ;;  %s2943_s1 = inlined_call_operand.hbm [shape: f32[2,8], index: 1, kind: input, shape index: {}]   ;;  %s2944_s2 = inlined_call_operand.vmem [shape: bf16[32,32], index: 2, kind: input, shape index: {}]   ;;  %s2945_s3 = inlined_call_operand.hbm [shape: f32[1,32], index: 3, kind: input, shape index: {}]   ;;  %s2946_s4 = inlined_call_operand.vmem [shape: bf16[32,32], index: 4, kind: input, shape index: {}]   ;;  %s2947_s5 = inlined_call_operand.hbm [shape: f32[1,32], index: 5, kind: input, shape index: {}]   ;;  %s2948_s6 = inlined_call_operand.hbm [shape: bf16[32,32], index: 6, kind: input, shape index: {}]   ;;  %s2949_s7 = inlined_call_operand.hbm [shape: f32[1,32], index: 7, kind: input, shape index: {}]   ;;  %s2950_s8 = inlined_call_operand.hbm [shape: bf16[32,32], index: 8, kind: input, shape index: {}]   ;;  %s2951_s9 = inlined_call_operand.hbm [shape: f32[1,32], index: 9, kind: input, shape index: {}]   ;;  %s2952_s10 = inlined_call_operand.vmem [shape: f32[1,32], index: 10, kind: input, shape index: {}]   ;;  %s2953_s11 = inlined_call_operand.vmem [shape: f32[1,32], index: 11, kind: input, shape index: {}]   ;;  %s2954_s12 = inlined_call_operand.vmem [shape: bf16[32,64], index: 12, kind: input, shape index: {}]   ;;  %s2955_s13 = inlined_call_operand.vmem [shape: f32[1,64], index: 13, kind: input, shape index: {}]   ;;  %s2956_s14 = inlined_call_operand.vmem [shape: bf16[64,32], index: 14, kind: input, shape index: {}]   ;;  %s2957_s15 = inlined_call_operand.vmem [shape: f32[1,32], index: 15, kind: input, shape index: {}]   ;;  %s2958_s16 = inlined_call_operand.vmem [shape: f32[1,32], index: 16, kind: input, shape index: {}]   ;;  %s2959_s17 = inlined_call_operand.vmem [shape: f32[1,32], index: 17, kind: input, shape index: {}]   ;;  %s2960_s18 = inlined_call_operand.hbm [shape: f32[2,8,32], index: 18, kind: output, shape index: {}]  }
   0x1   :  { %2974 = sst [smem:[#allocation30_spill]] %s2942_s0 }
   0x2   :  { %2975 = sst [smem:[#allocation31_spill]] %s2943_s1 }
   0x3   :  { %2976 = sst [smem:[#allocation32_spill]] %s2944_s2 }
   0x4   :  { %2977 = sst [smem:[#allocation33_spill]] %s2945_s3 }
   0x5   :  { %2978 = sst [smem:[#allocation34_spill]] %s2946_s4 }
   0x6   :  { %2979 = sst [smem:[#allocation35_spill]] %s2948_s6 }
   0x7   :  { %2980 = sst [smem:[#allocation36_spill]] %s2960_s18 }
   0x8   :  { %23 = vsyncpa [#allocation6], 0 }
   0x9   :  { %24 = vsyncpa [#allocation9], 0 }
   0xa   :  { %25 = vsyncpa [#allocation12], 0 }
   0xb   :  { %26 = vsyncpa [#allocation15], 0 }
   0xc   :  { %27 = vsyncpa [#allocation7], 0 }
   0xd   :  { %29 = vsyncpa [#allocation7 + $0x1], 0  ;;  %s2597_s27 = smov 0   ;;  %s2599_s28 = smov 0  }
   0xe   :  { %s2601_s29 = smov 0   ;;  %s2603_s30 = smov 0  }
   0xf   :  { %s2605_s0 = smov 0   ;;  %s2607_s19 = smov 0  }
  0x10 LB: > { %2981 = sst [smem:[#allocation23_spill]] %s2463_s27  ;;  %s1824_s1 = sadd.s32 4294967295, %s2483_s19   ;;  %s2483_s19 = sphi %s2607_s19, %s35_s19   ;;  %s2479_s0 = sphi %s2605_s0, %s3012_s0   ;;  %s2475_s30 = sphi %s2603_s30, %s3015_s30   ;;  %s2471_s29 = sphi %s2601_s29, %s3010_s29   ;;  %s2467_s28 = sphi %s2599_s28, %s3014_s28   ;;  %s2463_s27 = sphi %s2597_s27, %s3013_s27  }
  0x11   : > { %2982 = sst [smem:[#allocation24_spill]] %s2471_s29  ;;  %s1825_s20 = sadd.s32 4294967294, %s2483_s19  }
  0x12   : > { %2983 = sst [smem:[#allocation25_spill]] %s2479_s0  ;;  %s47_s21 = sadd.s32 1, %s2479_s0 }
  0x13   : > { %2984 = sst [smem:[#allocation26_spill]] %s2483_s19  ;;  %s439_s22 = sadd.s32 1, %s2471_s29 }
  0x14   : > { %p49_p0 = scmp.ge.s32.totalorder %s47_s21, 2  ;;  %p449_p1 = scmp.ne.s32.totalorder %s2471_s29, %s2467_s28 }
  0x15   : > { %p450_p2 = scmp.eq.s32.totalorder %s1824_s1, 1  ;;  %p455_p3 = scmp.ne.s32.totalorder %s2467_s28, %s2463_s27 }
  0x16   : > { %s3017_s21 = smov (%p49_p0, %s47_s21), 0  ;;  %p456_p5 = scmp.eq.s32.totalorder %s1825_s20, 1 }
  0x17   : > { %2985 = sst [smem:[#allocation27_spill]] %s3017_s21  ;;  %p2637_p4 = por %p450_p2, %p449_p1 }
  0x18   : > { %s434_s23 = ssub.s32 %s2479_s0, %s3017_s21  ;;  %p1826_p6 = scmp.ge.s32.totalorder %s2483_s19, 1 }
  0x19   : > { %s2986_s2 = scalar_select %p2637_p4, 1, 0 }
  0x1a   : > { %p437_p7 = scmp.eq.s32.totalorder %s434_s23, 0  ;;  %p2644_p8 = por %p456_p5, %p455_p3 }
  0x1b   : > { %p463_p9 = scmp.lt.s32.totalorder %s2483_s19, 3  ;;  %p2656_p11 = scmp.eq.s32.totalorder %s1824_s1, 0 }
  0x1c   : > { %s2987_s24 = scalar_select %p2644_p8, 1, 0 }
  0x1d   : > { %s2650_s25 = scalar_select %p437_p7, %s2471_s29, %s439_s22  }
  0x1e   : > { %2988 = sst [smem:[#allocation28_spill]] %s2987_s24  ;;  %p2652_p10 = pnand %p1826_p6, %p463_p9 }
  0x1f   : > { %2989 = sst [smem:[#allocation29_spill]] %s2650_s25  ;;  %s2485_s20 = smov [#allocation8]  }
  0x20   : > { %s2990_s26 = scalar_select %p2652_p10, 1, 0 }
  0x21   : > { %s2991_s27 = scalar_select %p2656_p11, 1, 0 }
  0x22   : > { %p2062_p12 = pneg %p2652_p10  ;;  %s490_s23 = sshll.u32 %s2485_s20, 4  ;;  %s491_s23 = int_to_ptr.vmem [resolvable:$true] %s490_s23 }
  0x23   : > { %s2486_s21 = smov [#allocation11]   ;;  %s2220_s25 = scalar_lea.vmem %s491_s23, 16 }
  0x24   : > { %s514_s0 = sshll.u32 %s2486_s21, 4  ;;  %p2664_p13 = pnand %p2656_p11, %p2062_p12  ;;  %s515_s0 = int_to_ptr.vmem [resolvable:$true] %s514_s0 }
  0x25   : > { %p2221_p1 = scmp.ne.s32.totalorder %s491_s23, %s2220_s25  ;;  %s2227_s20 = scalar_lea.vmem %s491_s23, 32 }
  0x26   : > { %p2670_p0 = pneg %p2664_p13  ;;  %p2228_p5 = scmp.lt.s32.totalorder %s491_s23, %s491_s23 }
  0x27   : > { %p2229_p6 = scmp.lt.s32.totalorder %s2227_s20, %s2220_s25 }
  0x28   : > { %p2223_p2 = pnand %p2221_p1, %p2670_p0 }
  0x29   : > { %p2230_p7 = por %p2229_p6, %p2228_p5 }
  0x2a   : > { %p2224_p3 = pneg %p2223_p2 }
  0x2c   : > { %p2231_p9 = pnand %p2230_p7, %p2224_p3 }
  0x2e   : > { %2234 = shalt.err (!%p2231_p9)
}
  0x2f   : > { %s2994_s3 = sld [smem:[#allocation33_spill]]  ;;  %s2246_s24 = scalar_lea.vmem %s515_s0, 256 }
  0x30   : > { %p2247_p12 = scmp.ne.s32.totalorder %s515_s0, %s2246_s24  ;;  %p2254_p1 = scmp.lt.s32.totalorder %s515_s0, %s515_s0 }
  0x31   : > { %p2255_p2 = scmp.lt.s32.totalorder %s2246_s24, %s2246_s24 }
  0x32   : > { %p2249_p8 = pnand %p2247_p12, %p2670_p0 }
  0x33   : > { %p2256_p11 = por %p2255_p2, %p2254_p1 }
  0x34   : > { %p2250_p4 = pneg %p2249_p8 }
  0x35   : > { %2068 = dma.hbm_to_vmem [thread:$0]  (!%p2664_p13), %s2994_s3, 16, %s491_s23, [#allocation9]  }
  0x36   : > { %p2257_p10 = pnand %p2256_p11, %p2250_p4 }
  0x38   : > { %2260 = shalt.err (!%p2257_p10)
}
  0x39   : > { %s2487_s25 = smov 64   ;;  %s2488_s20 = smov 4  }
  0x3a   : > { %s2995_s6 = sld [smem:[#allocation35_spill]]  ;;  %s2489_s29 = smov [#allocation14]  }
  0x3b   : > { %s538_s23 = sshll.u32 %s2489_s29, 4  ;;  %s539_s23 = int_to_ptr.vmem [resolvable:$true] %s538_s23 }
  0x3c   : > { %s2272_s21 = scalar_lea.vmem %s539_s23, 256  ;;  %p2280_p6 = scmp.lt.s32.totalorder %s539_s23, %s539_s23 }
  0x3d   : > { %p2273_p3 = scmp.ne.s32.totalorder %s539_s23, %s2272_s21  ;;  %p2281_p4 = scmp.lt.s32.totalorder %s2272_s21, %s2272_s21 }
  0x3f   : > { %p2275_p8 = pnand %p2273_p3, %p2670_p0  ;;  %p2282_p10 = por %p2281_p4, %p2280_p6 }
  0x40   : > { %2074 = dma.hbm_to_vmem [thread:$0]  (!%p2664_p13), %s2995_s6, 256, %s515_s0, [#allocation12], %s2487_s25, %s2487_s25, %s2488_s20  }
  0x41   : > { %p2276_p5 = pneg %p2275_p8 }
  0x43   : > { %p2283_p11 = pnand %p2282_p10, %p2276_p5 }
  0x45   : > { %2286 = shalt.err (!%p2283_p11)
}
  0x46   : > { %2080 = dma.hbm_to_vmem [thread:$0]  (!%p2664_p13), %s2950_s8, 256, %s539_s23, [#allocation15], %s2487_s25, %s2487_s25, %s2488_s20  }
  0x47   : > { %s2490_s18 = smov [#allocation5]   ;;  %s2491_s19 = smov [#allocation10]  }
  0x48   : > { %s476_s0 = sshll.u32 %s2490_s18, 4  ;;  %s504_s29 = sshll.u32 %s2491_s19, 4  ;;  %s477_s0 = int_to_ptr.vmem [resolvable:$true] %s476_s0  ;;  %s505_s29 = int_to_ptr.vmem [resolvable:$true] %s504_s29 }
  0x49   : > { %s2298_s6 = scalar_lea.vmem %s477_s0, 32  ;;  %p2306_p1 = scmp.lt.s32.totalorder %s477_s0, %s477_s0 }
  0x4a   : > { %p2299_p7 = scmp.ne.s32.totalorder %s477_s0, %s2298_s6  ;;  %p2307_p2 = scmp.lt.s32.totalorder %s2298_s6, %s2298_s6 }
  0x4c   : > { %p2301_p9 = pnand %p2299_p7, %p2670_p0  ;;  %p2308_p3 = por %p2307_p2, %p2306_p1 }
  0x4e   : > { %p2302_p12 = pneg %p2301_p9 }
  0x50   : > { %p2309_p8 = pnand %p2308_p3, %p2302_p12 }
  0x52   : > { %2312 = shalt.err (!%p2309_p8)
}
  0x53   : > { %s2996_s20 = sld [smem:[#allocation31_spill]]  ;;  %s2324_s23 = scalar_lea.vmem %s505_s29, 16 }
  0x54   : > { %p2325_p5 = scmp.ne.s32.totalorder %s505_s29, %s2324_s23  ;;  %s2331_s21 = scalar_lea.vmem %s505_s29, 32 }
  0x55   : > { %p2332_p10 = scmp.lt.s32.totalorder %s505_s29, %s505_s29  ;;  %p2333_p11 = scmp.lt.s32.totalorder %s2331_s21, %s2324_s23 }
  0x56   : > { %p2327_p6 = pnand %p2325_p5, %p2670_p0 }
  0x57   : > { %p2334_p7 = por %p2333_p11, %p2332_p10 }
  0x58   : > { %p2328_p4 = pneg %p2327_p6 }
  0x59   : > { %2065 = dma.hbm_to_vmem [thread:$0]  (!%p2664_p13), %s2996_s20, 32, %s477_s0, [#allocation6]  }
  0x5a   : > { %p2335_p9 = pnand %p2334_p7, %p2328_p4 }
  0x5c   : > { %2338 = shalt.err (!%p2335_p9)
}
  0x5d   : > { %2071 = dma.hbm_to_vmem [thread:$0]  (!%p2664_p13), %s2947_s5, 16, %s505_s29, [#allocation9]  }
  0x5e   : > { %s2492_s18 = smov [#allocation13]   ;;  %s2493_s19 = smov [#allocation16]  }
  0x5f   : > { %s528_s0 = sshll.u32 %s2492_s18, 4  ;;  %s552_s3 = sshll.u32 %s2493_s19, 4  ;;  %s529_s0 = int_to_ptr.vmem [resolvable:$true] %s528_s0  ;;  %s553_s3 = int_to_ptr.vmem [resolvable:$true] %s552_s3 }
  0x60   : > { %s2350_s25 = scalar_lea.vmem %s529_s0, 16  ;;  %s2357_s20 = scalar_lea.vmem %s529_s0, 32 }
  0x61   : > { %p2351_p12 = scmp.ne.s32.totalorder %s529_s0, %s2350_s25  ;;  %p2358_p3 = scmp.lt.s32.totalorder %s529_s0, %s529_s0 }
  0x62   : > { %p2359_p8 = scmp.lt.s32.totalorder %s2357_s20, %s2350_s25 }
  0x63   : > { %p2353_p1 = pnand %p2351_p12, %p2670_p0 }
  0x64   : > { %p2360_p5 = por %p2359_p8, %p2358_p3 }
  0x65   : > { %p2354_p2 = pneg %p2353_p1 }
  0x67   : > { %p2361_p6 = pnand %p2360_p5, %p2354_p2 }
  0x69   : > { %2364 = shalt.err (!%p2361_p6)
}
  0x6a   : > { %2077 = dma.hbm_to_vmem [thread:$0]  (!%p2664_p13), %s2949_s7, 16, %s529_s0, [#allocation12]  }
  0x6b   : > { %s2376_s21 = scalar_lea.vmem %s553_s3, 16  ;;  %s2383_s6 = scalar_lea.vmem %s553_s3, 32 }
  0x6c   : > { %p2377_p4 = scmp.ne.s32.totalorder %s553_s3, %s2376_s21  ;;  %p2384_p7 = scmp.lt.s32.totalorder %s553_s3, %s553_s3 }
  0x6d   : > { %p2385_p9 = scmp.lt.s32.totalorder %s2383_s6, %s2376_s21 }
  0x6e   : > { %p2379_p10 = pnand %p2377_p4, %p2670_p0 }
  0x6f   : > { %p2386_p12 = por %p2385_p9, %p2384_p7 }
  0x70   : > { %p2380_p11 = pneg %p2379_p10 }
  0x72   : > { %p2387_p1 = pnand %p2386_p12, %p2380_p11 }
  0x74   : > { %2390 = shalt.err (!%p2387_p1)
}
  0x75   : > { %2083 = dma.hbm_to_vmem [thread:$0]  (!%p2664_p13), %s2951_s9, 16, %s553_s3, [#allocation15]  }
  0x76   : > { %p2997_p2 = scmp.ne.s32.totalorder %s2990_s26, 0 }
  0x77   : > { %p2998_p3 = scmp.ne.s32.totalorder (!%p2997_p2), %s2991_s27, 0 }
  0x78   : > { %596 = sbr.rel (%p2997_p2) target bundleno = 2680 (0xa78), region = 92 }
  0x7d   : > { %2442 = dma.done.wait (%p2998_p3), [#allocation6], 32  }
  0x7e   : > { %2444 = vsyncadd (%p2998_p3), [#allocation6], 4294967264 }
  0x7f   : > { %2446 = dma.done.wait (%p2998_p3), [#allocation9], 32  }
  0x80   : > { %2448 = vsyncadd (%p2998_p3), [#allocation9], 4294967264 }
  0x81   : > { %2450 = dma.done.wait (%p2998_p3), [#allocation12], 272  }
  0x82   : > { %2452 = vsyncadd (%p2998_p3), [#allocation12], 4294967024 }
  0x83   : > { %2454 = dma.done.wait (%p2998_p3), [#allocation15], 272  }
  0x84   : > { %2456 = vsyncadd (%p2998_p3), [#allocation15], 4294967024  ;;  %p673_p13 = scmp.lt.s32.totalorder %s2475_s30, 1  ;;  %v2494_v0 = vmov 0.0   ;;  %vm2495_vm0 = vmmov 0   ;;  %s2999_s0 = sld [smem:[#allocation30_spill]] }
  0x85   : > { %1932 = vmatprep.subr.bf16.mxu0 %v2494_v0  ;;  %1936 = vmatprep.mubr.msk.bf16.mxu0 %vm2495_vm0, %v2494_v0  ;;  %s3000_s4 = sld [smem:[#allocation34_spill]]  ;;  %vm707_vm1 = vcmask 261120   ;;  %v2171_v7 = vld [vmem:[#allocation11 + $0x8] sm:$0xff]   ;;  %v2172_v8 = vld [vmem:[#allocation11] sm:$0xff]   ;;  %v1845_v9 = vld [vmem:[#allocation10] ss:$0 sm:$0xff] }
  0x86   : > { %s674_s26 = scalar_select %p673_p13, %s2475_s30, 1  ;;  %1940 = vmatprep.subr.bf16.mxu1 %v2494_v0  ;;  %1944 = vmatprep.mubr.msk.bf16.mxu1 %vm2495_vm0, %v2494_v0  ;;  %vm752_vm2 = vcmask 257024   ;;  %v1853_v16 = vld [vmem:[#allocation8] ss:$0 sm:$0xff]  ;;  %vm905_vm3 = vcmask 64512   ;;  %vm967_vm4 = vcmask 1043456  }
  0x87   : > { %s3001_s6 = sld [smem:[#allocation32_spill]]  ;;  %1941 = vmatpush3.bf16.msra.mxu1 %v2171_v7  ;;  %s2498_s1 = smov 104   ;;  %v1849_v31 = vld [vmem:[#allocation13] ss:$0 sm:$0xff]  ;;  %vm1136_vm5 = vcmask 125952   ;;  %vm1382_vm6 = vcmask 257152  }
  0x88   : > { %s1844_s22 = sshll.u32 %s674_s26, 3  ;;  %1942 = vmatprep.subr.bf16.mxu1 %v2494_v0  ;;  %s2496_s26 = smov 112   ;;  %vm1594_vm7 = vcmask 523264  }
  0x89   : > { %s895_s27 = scalar_lea.vmem [#allocation5], %s2475_s30  ;;  %s670_s24 = sand.u32 1, %s2467_s28  }
  0x8a   : > { %s676_s19 = scalar_lea.vmem %s2999_s0, %s1844_s22  ;;  %s2497_s22 = smov 120   ;;  %v1857_v49 = vld [vmem:[%s895_s27] ss:$0 sm:$0xff] }
  0x8b   : > { %v2167_v1 = vld [vmem:[%s3000_s4 + $0x8] sm:$0xff]   ;;  %v2168_v2 = vld [vmem:[%s3000_s4] sm:$0xff]   ;;  %1943 = vmatpush3.bf16.msra.mxu1 %v2172_v8  ;;  %s2499_s0 = smov 8   ;;  %s1843_s18 = sshll.u32 %s670_s24, 3 }
  0x8c   : > { %1933 = vmatpush3.bf16.msra.mxu0 %v2167_v1  ;;  %v2758_v3 = vld [vmem:[%s676_s19] sm:$0xff]  ;;  %1956 = vmatprep.subr.bf16.mxu1 %v2494_v0  ;;  %s2500_s19 = smov 16   ;;  %s3002_s29 = sld [smem:[#allocation36_spill]] }
  0x8d   : > { %1934 = vmatprep.subr.bf16.mxu0 %v2494_v0  ;;  %v2169_v4 = vld [vmem:[%s3001_s6 + $0x8] sm:$0xff]   ;;  %v683_v5 = vpack.c.bf16 %v2758_v3, %v2758_v3  ;;  %v2170_v6 = vld [vmem:[%s3001_s6] sm:$0xff]   ;;  %s1670_s4 = scalar_lea.sflag [#allocation7], %s670_s24  ;;  %p3004_p8 = scmp.ne.s32.totalorder %s2986_s2, 0 }
  0x8f   : > { %1945 = vmatmul.mubr.msk.bf16.vlgmr.msra.gmra.mxu1 %vm707_vm1, %v683_v5 }
  0x90   : > { %1935 = vmatpush3.bf16.msra.mxu0 %v2168_v2  ;;  %1958 = vmatprep.mubr.msk.bf16.mxu1 %vm2495_vm0, %v2494_v0 }
  0x91   : > { %1948 = vmatprep.subr.bf16.mxu0 %v2494_v0 }
  0x92   : > { %s3003_s23 = smov %s3002_s29 }
  0x93   : > { %1937 = vmatmul.mubr.msk.bf16.vlgmr.msra.gmra.mxu0 %vm707_vm1, %v683_v5 }
  0x94   : > { %1949 = vmatpush3.bf16.msra.mxu0 %v2169_v4  ;;  %1952 = vmatprep.mubr.msk.bf16.mxu0 %vm2495_vm0, %v2494_v0 }
  0x95   : > { %1950 = vmatprep.subr.bf16.mxu0 %v2494_v0 }
  0x98   : > { %1951 = vmatpush3.bf16.msra.mxu0 %v2170_v6 }
  0x99   : > { %1962 = vmatprep.subr.bf16.mxu0 %v2494_v0 }
  0x9b   : > { %1953 = vmatmul.mubr.msk.bf16.vlgmr.msra.gmra.mxu0 %vm707_vm1, %v683_v5 }
  0x9c   : > { %1964 = vmatprep.mubr.msk.bf16.mxu0 %vm2495_vm0, %v2494_v0 }
 0x14f   : > { %v811_v32 = vpop.f32.mrf.mxu1 }
 0x150   : > { %v812_v33 = vadd.f32 %v1849_v31, %v811_v32 }
 0x151   : > { %v1946_v34 = vpop.f32.mrf.mxu1 }
 0x152   : > { %v817_v35 = vpack.c.bf16 %v812_v33, %v812_v33 }
 0x153   : > { %v745_v10 = vpop.f32.mrf.mxu0  ;;  %v814_v36 = vpop.f32.mrf.mxu1 }
 0x154   : > { %v746_v11 = vadd.f32 %v1845_v9, %v745_v10  ;;  %819 = vst.msk [vmem:[#allocation2 + $0x4] sm:$0xf] %vm752_vm2, %v817_v35 }
 0x155   : > { %v1938_v12 = vpop.f32.mrf.mxu0  ;;  %v1947_v37 = vpop.f32.mrf.mxu1 }
 0x156   : > { %v751_v13 = vpack.c.bf16 %v746_v11, %v746_v11 }
 0x157   : > { %v748_v14 = vpop.f32.mrf.mxu0 }
 0x158   : > { %753 = vst.msk [vmem:[#allocation2] sm:$0xf] %vm752_vm2, %v751_v13 }
 0x159   : > { %v1939_v15 = vpop.f32.mrf.mxu0 }
 0x15b   : > { %v885_v17 = vpop.f32.mrf.mxu0  ;;  %v2797_v38 = vld [vmem:[#allocation2 + $0x4] sm:$0xf] }
 0x15c   : > { %v886_v18 = vadd.f32 %v1853_v16, %v885_v17  ;;  %v969_v39 = vsel %vm967_vm4, %v2797_v38, 0  ;;  %v1863_v17 = vcombine.low %v2797_v38, %v2797_v38  ;;  %v2178_v34 = vld [vmem:[#allocation2 + $0x4] ss:$0 sps:$4 sm:$0xff]  }
 0x15d   : > { %v1954_v19 = vpop.f32.mrf.mxu0  ;;  %1963 = vmatpush3.bf16.msra.mxu0 %v969_v39 }
 0x15e   : > { %v891_v20 = vmul.f32 0.35355338, %v886_v18  ;;  %1974 = vmatprep.subr.bf16.mxu0 %v2494_v0 }
 0x15f   : > { %v888_v21 = vpop.f32.mrf.mxu0  ;;  %v898_v22 = vld [vmem:[#allocation2] sm:$0xf] }
 0x160   : > { %v2173_v23 = vld [vmem:[#allocation2] ss:$0 sps:$4 sm:$0xff]   ;;  %v892_v24 = vpack.c.bf16 %v891_v20, %v891_v20  ;;  %v910_v25 = vsel %vm905_vm3, %v898_v22, 0  ;;  %v1861_v26 = vcombine.low %v898_v22, %v898_v22 }
 0x161   : > { %v1955_v27 = vpop.f32.mrf.mxu0  ;;  %1957 = vmatpush3.bf16.xpose.msra.mxu1 %v910_v25  ;;  %1149 = vrot.lane.b32.xlu1 %v2173_v23, %s2496_s26 }
 0x162   : > { %894 = vst.msk [vmem:[#allocation3] sm:$0xf] %vm752_vm2, %v892_v24  ;;  %1019 = vrot.lane.b32.xlu0 %v1861_v26, %s2497_s22  ;;  %1968 = vmatprep.subr.bf16.mxu1 %v2494_v0 }
 0x169   : > { %v897_v28 = vld [vmem:[#allocation3] sm:$0xf] }
 0x16a   : > { %v2175_v29 = vld [vmem:[#allocation3] ss:$0 sps:$4 sm:$0xff]   ;;  %1959 = vmatmul.mubr.msk.bf16.vlgmr.msra.gmra.mxu1 %vm905_vm3, %v897_v28  ;;  %v1860_v30 = vcombine.low %v897_v28, %v897_v28 }
 0x16b   : > { %1144 = vrot.lane.b32.xlu1 %v2175_v29, %s2496_s26  ;;  %1970 = vmatprep.mubr.msk.bf16.mxu1 %vm2495_vm0, %v2494_v0 }
 0x16c   : > { %1014 = vrot.lane.b32.xlu0 %v1860_v30, %s2497_s22 }
 0x16f   : > { %1260 = vrot.lane.b32.xlu1 %v2175_v29, %s2498_s1 }
 0x170   : > { %1262 = vrot.lane.b32.xlu0 %v2173_v23, %s2498_s1 }
 0x1d3   : > { %v1150_v42 = vpop.permute.xlu1 %1149 }
 0x1d4   : > { %v1020_v40 = vpop.permute.xlu0 %1019  ;;  %v1155_v44 = vsel %vm905_vm3, %v1150_v42, 0 }
 0x1d5   : > { %v1025_v41 = vsel %vm905_vm3, %v1020_v40, 0 }
 0x1d6   : > { %1969 = vmatpush3.bf16.xpose.msra.mxu1 %v1025_v41 }
 0x1d7   : > { %1980 = vmatprep.subr.bf16.mxu1 %v2494_v0 }
 0x1dd   : > { %v1145_v46 = vpop.permute.xlu1 %1144 }
 0x1de   : > { %v1015_v43 = vpop.permute.xlu0 %1014 }
 0x1df   : > { %1971 = vmatmul.mubr.msk.bf16.vlgmr.msra.gmra.mxu1 %vm905_vm3, %v1015_v43 }
 0x1e0   : > { %1981 = vmatpush3.bf16.xpose.msra.mxu1 %v1155_v44  ;;  %1982 = vmatprep.mubr.msk.bf16.mxu1 %vm2495_vm0, %v2494_v0 }
 0x1e1   : > { %1992 = vmatprep.subr.bf16.mxu1 %v2494_v0  ;;  %v1261_v48 = vpop.permute.xlu1 %1260 }
 0x1e2   : > { %v1263_v45 = vpop.permute.xlu0 %1262 }
 0x1e3   : > { %v1268_v47 = vsel %vm905_vm3, %v1263_v45, 0 }
 0x1e7   : > { %1983 = vmatmul.mubr.msk.bf16.vlgmr.msra.gmra.mxu1 %vm905_vm3, %v1145_v46 }
 0x1e8   : > { %1993 = vmatpush3.bf16.xpose.msra.mxu1 %v1268_v47  ;;  %1994 = vmatprep.mubr.msk.bf16.mxu1 %vm2495_vm0, %v2494_v0 }
 0x1e9   : > { %2004 = vmatprep.subr.bf16.mxu1 %v2494_v0 }
 0x1ef   : > { %1995 = vmatmul.mubr.msk.bf16.vlgmr.msra.gmra.mxu1 %vm905_vm3, %v1261_v48 }
 0x1f0   : > { %2008 = vmatprep.mubr.msk.bf16.mxu1 %vm2495_vm0, %v2494_v0 }
 0x22a   : > { %v946_v50 = vpop.f32.mrf.mxu1 }
 0x22b   : > { %v947_v51 = vadd.f32 %v1857_v49, %v946_v50 }
 0x22c   : > { %v1960_v52 = vpop.f32.mrf.mxu1 }
 0x22d   : > { %v952_v53 = vsel %vm905_vm3, %v947_v51, -inf }
 0x22e   : > { %953 = vmax.xlane.f32.xlu0 %v952_v53  ;;  %v949_v54 = vpop.f32.mrf.mxu1 }
 0x230   : > { %v1961_v55 = vpop.f32.mrf.mxu1 }
 0x29f   : > { %v1061_v56 = vpop.f32.mrf.mxu1 }
 0x2a0   : > { %v1062_v57 = vadd.f32 %v1857_v49, %v1061_v56 }
 0x2a1   : > { %v1972_v58 = vpop.f32.mrf.mxu1 }
 0x2a2   : > { %v1067_v59 = vsel %vm905_vm3, %v1062_v57, -inf }
 0x2a3   : > { %1068 = vmax.xlane.f32.xlu1 %v1067_v59  ;;  %v1064_v60 = vpop.f32.mrf.mxu1 }
 0x2a5   : > { %v1973_v61 = vpop.f32.mrf.mxu1 }
 0x2a7   : > { %v1191_v62 = vpop.f32.mrf.mxu1 }
 0x2a8   : > { %v1192_v63 = vadd.f32 %v1857_v49, %v1191_v62 }
 0x2a9   : > { %v1984_v1 = vpop.f32.mrf.mxu1 }
 0x2aa   : > { %v1197_v2 = vsel %vm905_vm3, %v1192_v63, -inf }
 0x2ab   : > { %1198 = vmax.xlane.f32.xlu0 %v1197_v2  ;;  %v1194_v4 = vpop.f32.mrf.mxu1 }
 0x2ad   : > { %v1985_v5 = vpop.f32.mrf.mxu1 }
 0x2af   : > { %v1304_v6 = vpop.f32.mrf.mxu1 }
 0x2b0   : > { %v1305_v7 = vadd.f32 %v1857_v49, %v1304_v6 }
 0x2b1   : > { %v1996_v8 = vpop.f32.mrf.mxu1 }
 0x2b2   : > { %v1310_v9 = vsel %vm905_vm3, %v1305_v7, -inf }
 0x2b3   : > { %1311 = vmax.xlane.f32.xlu0 %v1310_v9  ;;  %v1307_v10 = vpop.f32.mrf.mxu1 }
 0x2b5   : > { %v1997_v11 = vpop.f32.mrf.mxu1 }
 0x2b7   : > { %v954_v12 = vpop.xlane.xlu0 %953 }
 0x2b8   : > { %v955_v13 = vsub.f32 %v947_v51, %v954_v12 }
 0x2ba   : > { %v956_v14 = vmul.f32 1.442695, %v955_v13  ;;  %v2179_v13 = vld [vmem:[#allocation14 + $0x8] sm:$0xff]  }
 0x2bb   : > { %2005 = vmatpush3.bf16.msra.mxu1 %v2179_v13 }
 0x2bc   : > { %2187 = vpow2.f32 %v956_v14  ;;  %v2180_v14 = vld [vmem:[#allocation14] sm:$0xff]   ;;  %2006 = vmatprep.subr.bf16.mxu1 %v2494_v0 }
 0x2bf   : > { %2007 = vmatpush3.bf16.msra.mxu1 %v2180_v14  ;;  %v1889_v14 = vld [vmem:[%s2958_s16] ss:$0 sm:$0xff] }
 0x2c0   : > { %2020 = vmatprep.subr.bf16.mxu1 %v2494_v0 }
 0x2c9   : > { %v2188_v15 = vpop.eup %2187 }
 0x2ca   : > { %v958_v16 = vsel %vm905_vm3, %v2188_v15, 0.0 }
 0x2cb   : > { %959 = vadd.xlane.f32.xlu1 %v958_v16 }
 0x2dc   : > { %1082 = vrot.lane.b32.xlu1 %v1863_v17, %s2497_s22  ;;  %s2501_s22 = smov [#allocation17]  }
 0x32c   : > { %v1069_v18 = vpop.xlane.xlu1 %1068 }
 0x32d   : > { %v1070_v19 = vsub.f32 %v1062_v57, %v1069_v18 }
 0x32f   : > { %v1071_v20 = vmul.f32 1.442695, %v1070_v19 }
 0x331   : > { %2189 = vpow2.f32 %v1071_v20  ;;  %v1873_v20 = vld [vmem:[#allocation16] ss:$0 sm:$0xff] }
 0x334   : > { %v1199_v21 = vpop.xlane.xlu0 %1198 }
 0x335   : > { %v1200_v22 = vsub.f32 %v1192_v63, %v1199_v21 }
 0x337   : > { %v1201_v23 = vmul.f32 1.442695, %v1200_v22 }
 0x339   : > { %2191 = vpow2.f32 %v1201_v23 }
 0x33c   : > { %v1312_v24 = vpop.xlane.xlu0 %1311 }
 0x33d   : > { %v1313_v25 = vsub.f32 %v1305_v7, %v1312_v24 }
 0x33e   : > { %v2190_v26 = vpop.eup %2189 }
 0x33f   : > { %v1314_v27 = vmul.f32 1.442695, %v1313_v25  ;;  %v1073_v28 = vsel %vm905_vm3, %v2190_v26, 0.0 }
 0x340   : > { %1074 = vadd.xlane.f32.xlu0 %v1073_v28 }
 0x341   : > { %2193 = vpow2.f32 %v1314_v27 }
 0x346   : > { %v2192_v29 = vpop.eup %2191 }
 0x347   : > { %v1203_v30 = vsel %vm905_vm3, %v2192_v29, 0.0 }
 0x348   : > { %1204 = vadd.xlane.f32.xlu1 %v1203_v30 }
 0x34e   : > { %v2194_v31 = vpop.eup %2193 }
 0x34f   : > { %v1316_v32 = vsel %vm905_vm3, %v2194_v31, 0.0 }
 0x350   : > { %1317 = vadd.xlane.f32.xlu0 %v1316_v32 }
 0x354   : > { %v960_v33 = vpop.xlane.xlu1 %959 }
 0x355   : > { %2195 = vrcp.f32 %v960_v33  ;;  %v2181_v33 = vld [vmem:[%s2954_s12 + $0x8] sm:$0xff]  }
 0x358   : > { %v1083_v37 = vpop.permute.xlu1 %1082 }
 0x359   : > { %1322 = vrot.lane.b32.xlu1 %v2178_v34, %s2498_s1  ;;  %v1088_v39 = vsel %vm967_vm4, %v1083_v37, 0  ;;  %s2395_s1 = sshll.u32 %s2501_s22, 4  ;;  %s2396_s1 = int_to_ptr.vmem [resolvable:$false] %s2395_s1 }
 0x362   : > { %v2196_v35 = vpop.eup %2195 }
 0x363   : > { %v962_v36 = vmul.f32 %v2196_v35, %v2188_v15 }
 0x365   : > { %v963_v38 = vpack.c.bf16 %v962_v36, %v962_v36 }
 0x366   : > { %1212 = vrot.lane.b32.xlu0 %v2178_v34, %s2496_s26 }
 0x367   : > { %1965 = vmatmul.mubr.msk.bf16.vlgmr.msra.gmra.mxu0 %vm905_vm3, %v963_v38  ;;  %v1877_v38 = vld [vmem:[%s2952_s10] ss:$0 sm:$0xff] }
 0x368   : > { %1975 = vmatpush3.bf16.msra.mxu0 %v1088_v39  ;;  %1976 = vmatprep.mubr.msk.bf16.mxu0 %vm2495_vm0, %v2494_v0 }
 0x369   : > { %1986 = vmatprep.subr.bf16.mxu0 %v2494_v0 }
 0x3c9   : > { %v1075_v40 = vpop.xlane.xlu0 %1074 }
 0x3ca   : > { %2197 = vrcp.f32 %v1075_v40  ;;  %v1878_v40 = vld [vmem:[%s2953_s11] ss:$0 sm:$0xff] }
 0x3d1   : > { %v1205_v41 = vpop.xlane.xlu1 %1204 }
 0x3d2   : > { %2199 = vrcp.f32 %v1205_v41 }
 0x3d5   : > { %v1323_v50 = vpop.permute.xlu1 %1322 }
 0x3d6   : > { %v1328_v52 = vsel %vm967_vm4, %v1323_v50, 0 }
 0x3d7   : > { %v2198_v42 = vpop.eup %2197 }
 0x3d8   : > { %v1077_v43 = vmul.f32 %v2198_v42, %v2190_v26 }
 0x3d9   : > { %v1318_v44 = vpop.xlane.xlu0 %1317 }
 0x3da   : > { %2201 = vrcp.f32 %v1318_v44  ;;  %v1078_v45 = vpack.c.bf16 %v1077_v43, %v1077_v43  ;;  %v2183_v44 = vld [vmem:[%s2956_s14 + $0x18] sm:$0xff]  }
 0x3dc   : > { %1977 = vmatmul.mubr.msk.bf16.vlgmr.msra.gmra.mxu0 %vm905_vm3, %v1078_v45  ;;  %v2184_v45 = vld [vmem:[%s2956_s14 + $0x10] sm:$0xff]  }
 0x3dd   : > { %v1213_v46 = vpop.permute.xlu0 %1212  ;;  %1988 = vmatprep.mubr.msk.bf16.mxu0 %vm2495_vm0, %v2494_v0 }
 0x3de   : > { %v1218_v47 = vsel %vm967_vm4, %v1213_v46, 0  ;;  %v2185_v46 = vld [vmem:[%s2956_s14 + $0x8] sm:$0xff]  }
 0x3df   : > { %v2200_v48 = vpop.eup %2199  ;;  %1987 = vmatpush3.bf16.msra.mxu0 %v1218_v47  ;;  %v2186_v47 = vld [vmem:[%s2956_s14] sm:$0xff]  }
 0x3e0   : > { %1998 = vmatprep.subr.bf16.mxu0 %v2494_v0  ;;  %v1207_v49 = vmul.f32 %v2200_v48, %v2192_v29  ;;  %v1879_v48 = vld [vmem:[%s2955_s13] ss:$0 sm:$0xff] }
 0x3e2   : > { %v1208_v51 = vpack.c.bf16 %v1207_v49, %v1207_v49 }
 0x3e4   : > { %1989 = vmatmul.mubr.msk.bf16.vlgmr.msra.gmra.mxu0 %vm905_vm3, %v1208_v51 }
 0x3e5   : > { %1999 = vmatpush3.bf16.msra.mxu0 %v1328_v52  ;;  %2000 = vmatprep.mubr.msk.bf16.mxu0 %vm2495_vm0, %v2494_v0 }
 0x3e6   : > { %2012 = vmatprep.subr.bf16.mxu0 %v2494_v0 }
 0x3e7   : > { %v2202_v53 = vpop.eup %2201 }
 0x3e8   : > { %v1320_v54 = vmul.f32 %v2202_v53, %v2194_v31 }
 0x3ea   : > { %v1321_v55 = vpack.c.bf16 %v1320_v54, %v1320_v54 }
 0x3ec   : > { %2001 = vmatmul.mubr.msk.bf16.vlgmr.msra.gmra.mxu0 %vm905_vm3, %v1321_v55 }
 0x3ed   : > { %2016 = vmatprep.mubr.msk.bf16.mxu0 %vm2495_vm0, %v2494_v0  ;;  %2013 = vmatpush3.bf16.msra.mxu0 %v2181_v33 }
 0x3ee   : > { %2014 = vmatprep.subr.bf16.mxu0 %v2494_v0 }
 0x427   : > { %v1005_v56 = vpop.f32.mrf.mxu0 }
 0x429   : > { %v1966_v57 = vpop.f32.mrf.mxu0 }
 0x42b   : > { %v1008_v58 = vpop.f32.mrf.mxu0 }
 0x42d   : > { %v1967_v59 = vpop.f32.mrf.mxu0 }
 0x42e   : > { %v1883_v59 = vld [vmem:[%s2957_s15] ss:$0 sm:$0xff] }
 0x49c   : > { %v1124_v60 = vpop.f32.mrf.mxu0 }
 0x49d   : > { %1131 = vrot.lane.b32.xlu0 %v1124_v60, %s2499_s0 }
 0x49e   : > { %v1978_v61 = vpop.f32.mrf.mxu0 }
 0x4a0   : > { %v1127_v62 = vpop.f32.mrf.mxu0 }
 0x4a2   : > { %v1979_v63 = vpop.f32.mrf.mxu0 }
 0x4a4   : > { %v1254_v1 = vpop.f32.mrf.mxu0 }
 0x4a6   : > { %v1990_v2 = vpop.f32.mrf.mxu0 }
 0x4a8   : > { %v1257_v4 = vpop.f32.mrf.mxu0 }
 0x4aa   : > { %v1991_v5 = vpop.f32.mrf.mxu0 }
 0x4ac   : > { %v1364_v6 = vpop.f32.mrf.mxu0 }
 0x4ad   : > { %1371 = vrot.lane.b32.xlu1 %v1364_v6, %s2499_s0  ;;  %s1892_s0 = sshll.u32 %s2475_s30, 7  ;;  %s2397_s30 = scalar_lea.vmem %s2396_s1, 256 }
 0x4ae   : > { %v2002_v7 = vpop.f32.mrf.mxu0  ;;  %s1682_s21 = scalar_lea.hbm %s3002_s29, %s1892_s0 }
 0x4b0   : > { %v1367_v8 = vpop.f32.mrf.mxu0 }
 0x4b2   : > { %v2003_v9 = vpop.f32.mrf.mxu0 }
 0x50f   : > { %v1132_v10 = vpop.permute.xlu0 %1131 }
 0x510   : > { %v1134_v11 = vsel %vm905_vm3, %v1005_v56, %v1132_v10 }
 0x511   : > { %v1135_v12 = vpack.c.bf16 %v1134_v11, %v1134_v11 }
 0x513   : > { %1137 = vst.msk [vmem:[#allocation4] sm:$0xf] %vm1136_vm5, %v1135_v12 }
 0x51f   : > { %v1372_v15 = vpop.permute.xlu1 %1371 }
 0x520   : > { %v1374_v16 = vsel %vm905_vm3, %v1254_v1, %v1372_v15 }
 0x521   : > { %v1895_v17 = vpack.c.bf16 %v1374_v16, %v1374_v16  ;;  %v1890_v16 = vld [vmem:[%s2959_s17] ss:$0 sm:$0xff] }
 0x523   : > { %1379 = vrot.lane.b32.xlu1 %v1895_v17, %s2500_s19  ;;  %s672_s19 = scalar_lea.vmem [#allocation17], %s1843_s18 }
 0x524   : > { %s1684_s3 = sshll.u32 %s672_s19, 4  ;;  %s1685_s3 = int_to_ptr.vmem [resolvable:$true] %s1684_s3 }
 0x525   : > { %s2391_s26 = scalar_lea.vmem %s1685_s3, 128  ;;  %p2398_p4 = scmp.lt.s32.totalorder %s1685_s3, %s2396_s1 }
 0x526   : > { %p2392_p0 = scmp.ne.s32.totalorder %s1685_s3, %s2391_s26  ;;  %p2399_p10 = scmp.lt.s32.totalorder %s2397_s30, %s2391_s26 }
 0x528   : > { %p2393_p5 = pnand %p2392_p0, %p3004_p8  ;;  %p2400_p11 = por %p2399_p10, %p2398_p4 }
 0x52a   : > { %p2394_p6 = pneg %p2393_p5 }
 0x52c   : > { %p2401_p7 = pnand %p2400_p11, %p2394_p6 }
 0x595   : > { %v1380_v18 = vpop.permute.xlu1 %1379 }
 0x596   : > { %1383 = vst.msk [vmem:[#allocation4] sm:$0xf] %vm1382_vm6, %v1380_v18 }
 0x59d   : > { %v1384_v19 = vld [vmem:[#allocation4] sm:$0xf] }
 0x59e   : > { %2009 = vmatmul.mubr.msk.bf16.vlgmr.msra.gmra.mxu1 %vm707_vm1, %v1384_v19 }
 0x59f   : > { %2028 = vmatprep.mubr.msk.bf16.mxu1 %vm2495_vm0, %v2494_v0  ;;  %2021 = vmatpush3.bf16.msra.mxu1 %v2183_v44 }
 0x5a0   : > { %2022 = vmatprep.subr.bf16.mxu1 %v2494_v0 }
 0x5a3   : > { %2023 = vmatpush3.bf16.msra.mxu1 %v2184_v45 }
 0x5a4   : > { %2024 = vmatprep.subr.bf16.mxu1 %v2494_v0 }
 0x5a7   : > { %2025 = vmatpush3.bf16.msra.mxu1 %v2185_v46 }
 0x5a8   : > { %2026 = vmatprep.subr.bf16.mxu1 %v2494_v0 }
 0x5ab   : > { %2027 = vmatpush3.bf16.msra.mxu1 %v2186_v47 }
 0x65e   : > { %v1445_v21 = vpop.f32.mrf.mxu1 }
 0x65f   : > { %v1446_v22 = vadd.f32 %v1873_v20, %v1445_v21 }
 0x660   : > { %v2010_v23 = vpop.f32.mrf.mxu1 }
 0x661   : > { %v1451_v24 = vadd.f32 %v1446_v22, %v2758_v3  ;;  %v2182_v3 = vld [vmem:[%s2954_s12] sm:$0xff]  }
 0x662   : > { %v1448_v25 = vpop.f32.mrf.mxu1  ;;  %2015 = vmatpush3.bf16.msra.mxu0 %v2182_v3 }
 0x663   : > { %v1454_v26 = vsel %vm707_vm1, %v1451_v24, 0.0 }
 0x664   : > { %1455 = vadd.xlane.f32.xlu0 %v1454_v26  ;;  %v2011_v27 = vpop.f32.mrf.mxu1 }
 0x6ed   : > { %v1456_v28 = vpop.xlane.xlu0 %1455 }
 0x6ee   : > { %v1458_v29 = vmul.f32 0.03125, %v1456_v28 }
 0x6f0   : > { %v1459_v30 = vsub.f32 %v1451_v24, %v1458_v29 }
 0x6f2   : > { %v1460_v31 = vmul.f32 %v1459_v30, %v1459_v30 }
 0x6f4   : > { %v1461_v32 = vsel %vm707_vm1, %v1460_v31, 0.0 }
 0x6f5   : > { %1462 = vadd.xlane.f32.xlu1 %v1461_v32 }
 0x77e   : > { %v1463_v34 = vpop.xlane.xlu1 %1462 }
 0x77f   : > { %v1464_v35 = vmul.f32 0.03125, %v1463_v34 }
 0x781   : > { %v1465_v36 = vadd.f32 1e-12, %v1464_v35 }
 0x783   : > { %2203 = vrsqrt.f32 %v1465_v36 }
 0x790   : > { %v2204_v37 = vpop.eup %2203 }
 0x791   : > { %v1467_v39 = vmul.f32 %v2204_v37, %v1459_v30 }
 0x793   : > { %v1474_v41 = vmul.f32 %v1877_v38, %v1467_v39 }
 0x795   : > { %v1481_v42 = vadd.f32 %v1878_v40, %v1474_v41 }
 0x797   : > { %v1482_v43 = vpack.c.bf16 %v1481_v42, %v1481_v42 }
 0x799   : > { %2017 = vmatmul.mubr.msk.bf16.vlgmr.msra.gmra.mxu0 %vm707_vm1, %v1482_v43 }
 0x859   : > { %v1543_v49 = vpop.f32.mrf.mxu0 }
 0x85a   : > { %v1544_v50 = vadd.f32 %v1879_v48, %v1543_v49 }
 0x85b   : > { %v2018_v51 = vpop.f32.mrf.mxu0 }
 0x85c   : > { %v1550_v52 = vmul.f32 0.70710677, %v1544_v50  ;;  %v1549_v56 = vmul.f32 0.5, %v1544_v50 }
 0x85d   : > { %v1546_v53 = vpop.f32.mrf.mxu0 }
 0x85e   : > { %2205 = verf.f32 %v1550_v52 }
 0x85f   : > { %v2019_v54 = vpop.f32.mrf.mxu0 }
 0x86b   : > { %v2206_v55 = vpop.eup %2205 }
 0x86c   : > { %v1552_v57 = vadd.f32 1.0, %v2206_v55 }
 0x86e   : > { %v1553_v0 = vmul.f32 %v1552_v57, %v1549_v56 }
 0x870   : > { %v1554_v58 = vpack.c.bf16 %v1553_v0, %v1553_v0 }
 0x872   : > { %2029 = vmatmul.mubr.msk.bf16.vlgmr.msra.gmra.mxu1 %vm1594_vm7, %v1554_v58 }
 0x932   : > { %v1632_v60 = vpop.f32.mrf.mxu1 }
 0x933   : > { %v1633_v61 = vadd.f32 %v1883_v59, %v1632_v60 }
 0x934   : > { %v2030_v62 = vpop.f32.mrf.mxu1 }
 0x935   : > { %v1638_v63 = vadd.f32 %v1633_v61, %v1481_v42 }
 0x936   : > { %v1635_v1 = vpop.f32.mrf.mxu1 }
 0x937   : > { %v1641_v2 = vsel %vm707_vm1, %v1638_v63, 0.0 }
 0x938   : > { %1642 = vadd.xlane.f32.xlu0 %v1641_v2  ;;  %v2031_v4 = vpop.f32.mrf.mxu1 }
 0x9c1   : > { %v1643_v5 = vpop.xlane.xlu0 %1642 }
 0x9c2   : > { %v1644_v6 = vmul.f32 0.03125, %v1643_v5 }
 0x9c4   : > { %v1645_v7 = vsub.f32 %v1638_v63, %v1644_v6 }
 0x9c6   : > { %v1646_v8 = vmul.f32 %v1645_v7, %v1645_v7 }
 0x9c8   : > { %v1647_v9 = vsel %vm707_vm1, %v1646_v8, 0.0 }
 0x9c9   : > { %1648 = vadd.xlane.f32.xlu0 %v1647_v9 }
 0xa52   : > { %v1649_v10 = vpop.xlane.xlu0 %1648 }
 0xa53   : > { %v1650_v11 = vmul.f32 0.03125, %v1649_v10 }
 0xa55   : > { %v1651_v12 = vadd.f32 1e-12, %v1650_v11 }
 0xa57   : > { %2207 = vrsqrt.f32 %v1651_v12 }
 0xa64   : > { %v2208_v13 = vpop.eup %2207 }
 0xa65   : > { %v1653_v15 = vmul.f32 %v2208_v13, %v1645_v7 }
 0xa67   : > { %v1660_v17 = vmul.f32 %v1889_v14, %v1653_v15 }
 0xa69   : > { %v1667_v18 = vadd.f32 %v1890_v16, %v1660_v17 }
 0xa6b   : > { %1668 = vst.msk [vmem:[%s672_s19] sm:$0xff] %vm707_vm1, %v1667_v18 }
 0xa6c   : > { %2404 = shalt.err (!%p2401_p7)
}
 0xa6d   : > { %s2405_s18 = scalar_lea.hbm %s1682_s21, 128  ;;  %s2409_s0 = scalar_lea.hbm %s3003_s23, 256 }
 0xa6e   : > { %p2406_p9 = scmp.ne.s32.totalorder %s1682_s21, %s2405_s18  ;;  %p2410_p2 = scmp.lt.s32.totalorder %s1682_s21, %s3003_s23 }
 0xa6f   : > { %p2411_p3 = scmp.lt.s32.totalorder %s2409_s0, %s2405_s18 }
 0xa70   : > { %p2407_p12 = pnand %p2406_p9, %p3004_p8 }
 0xa71   : > { %p2412_p13 = por %p2411_p3, %p2410_p2 }
 0xa72   : > { %p2408_p1 = pneg %p2407_p12 }
 0xa74   : > { %p2413_p0 = pnand %p2412_p13, %p2408_p1 }
 0xa76   : > { %2416 = shalt.err (!%p2413_p0)
}
 0xa77   : > { %2060 = dma.vmem_to_hbm [thread:$0]  (%p3004_p8), %s1685_s3, 128, %s1682_s21, %s1670_s4  }
 0xa78 PF: > { %s3005_s20 = sld [smem:[#allocation26_spill]] }
 0xa79   : > { %s3006_s29 = sld [smem:[#allocation23_spill]] }
 0xa7a   : > { %s3007_s26 = sld [smem:[#allocation28_spill]] }
 0xa7e   : > { %p2102_p5 = scmp.ge.s32.totalorder %s3005_s20, 2 }
 0xa7f   : > { %s1696_s22 = sand.u32 1, %s3006_s29  }
 0xa80   : > { %p3008_p6 = scmp.ne.s32.totalorder %s3007_s26, 0  ;;  %s1697_s1 = scalar_lea.sflag [#allocation7], %s1696_s22 }
 0xa82   : > { %p2085_p4 = pnand %p2102_p5, %p3008_p6 }
 0xa84   : > { %p2086_p10 = pneg %p2085_p4 }
 0xa86   : > { %2458 = dma.done.wait (%p2086_p10), %s1697_s1, 128  }
 0xa87   : > { %2460 = vsyncadd (%p2086_p10), %s1697_s1, 4294967168  ;;  %s35_s19 = sadd.s32 1, %s3005_s20   ;;  %s3009_s30 = sld [smem:[#allocation24_spill]] }
 0xa88   : > { %p32_p11 = scmp.ge.s32.totalorder %s35_s19, 4   ;;  %s3010_s29 = sld [smem:[#allocation29_spill]] }
 0xa89   : > { %s3011_s2 = sld [smem:[#allocation25_spill]]  ;;  %s3013_s27 = smov %s2467_s28 }
 0xa8a   : > { %s3012_s0 = sld [smem:[#allocation27_spill]] }
 0xa8b   :  { %34 = sbr.rel (!%p32_p11) target bundleno = 16 (0x10), region = 164 }
 0xa8d   : > { %s3014_s28 = smov %s3009_s30 }
 0xa8f   : > { %s3015_s30 = smov %s3011_s2 }
 0xa90   :  { %1702 = vsyncpa [#allocation6], 1 }
 0xa91   :  { %1704 = vsyncpa [#allocation6 + $0x1], 1 }
 0xa92   :  { %1705 = vsyncpa [#allocation9], 1 }
 0xa93   :  { %1706 = vsyncpa [#allocation12], 1 }
 0xa94   :  { %1707 = vsyncpa [#allocation15], 1 }
 0xa95   :  { %1708 = vsyncpa [#allocation7], 1 }
 0xa96   :  { %1710 = vsyncpa [#allocation7 + $0x1], 1 }

</bundles_post_ra>
